<compile_context>
chip_gen: v5e
topology: v5e:2x2
jax: 0.10.0
libtpu: 0.0.40
codegen_flags: <defaults>
</compile_context>

<pallas_src>
import functools

import jax
import jax.numpy as jnp
from jax.experimental import pallas as pl
from jax.experimental.pallas import tpu as pltpu


def _round_up(x, m):
    return (x + m - 1) // m * m


# ----------------------------------------------------------------------------
# Fused kernel: one time-chunk = input proj + GRU recurrence + fc proj.
# ----------------------------------------------------------------------------
def _fused_gru_decoder_kernel(z_ref, wi_ref, bi_ref, wh_ref, bh_ref,
                              wf_ref, bf_ref, out_ref, h_ref, *, hk, unroll):
    """Shapes (per grid step):
    z_ref   : (tc, B, L)   f32    latent inputs for this chunk
    wi_ref  : (L,  Ng)            fused input->gates weights (gate g at cols [g*hk, g*hk+H))
    bi_ref  : (1,  Ng)     f32
    wh_ref  : (Hk, Ng)            fused hidden->gates weights
    bh_ref  : (1,  Ng)     f32
    wf_ref  : (Hk, Op)            fc weights
    bf_ref  : (1,  Op)     f32
    out_ref : (tc, B, Op)  f32    decoder outputs for this chunk
    h_ref   : (B, Hk)      f32    VMEM scratch carrying h across chunks (grid steps)
    """
    @pl.when(pl.program_id(0) == 0)
    def _():
        h_ref[...] = jnp.zeros_like(h_ref)        # h_0 = 0 (PyTorch default)

    # Hoist grid-invariant weights/biases out of the time loop.
    wi = wi_ref[...]
    bi = bi_ref[...]
    wh = wh_ref[...]
    bh = bh_ref[...]
    wf = wf_ref[...]
    bf = bf_ref[...]
    wdt = wi.dtype
    t_chunk = z_ref.shape[0]

    def step(t, h):
        # Input projection: independent of the recurrence -> overlaps under unroll.
        gi = jnp.dot(z_ref[t].astype(wdt), wi,
                     preferred_element_type=jnp.float32) + bi
        # Hidden projection: the only matmul on the serial dependence chain.
        gh = jnp.dot(h.astype(wdt), wh,
                     preferred_element_type=jnp.float32) + bh
        # r and z share one sigmoid over the contiguous r|z slab (single EUP push).
        rz = jax.nn.sigmoid(gi[:, :2 * hk] + gh[:, :2 * hk])
        r = rz[:, :hk]
        zg = rz[:, hk:2 * hk]
        n = jnp.tanh(gi[:, 2 * hk:3 * hk] + r * gh[:, 2 * hk:3 * hk])
        h_new = (1.0 - zg) * n + zg * h
        # fc projection: nothing downstream in the loop depends on it -> also overlaps.
        out_ref[t] = (jnp.dot(h_new.astype(wdt), wf,
                              preferred_element_type=jnp.float32)
                      + bf).astype(out_ref.dtype)
        return h_new

    h_ref[...] = jax.lax.fori_loop(0, t_chunk, step, h_ref[...], unroll=unroll)


# ----------------------------------------------------------------------------
# One-time parameter packing (hoisted out of the forward path).
# ----------------------------------------------------------------------------
def prepare_params(w_ih, w_hh, b_ih, b_hh, w_fc, b_fc, *,
                   weight_dtype=jnp.bfloat16):
    """PyTorch layout: w_ih (3H,L), w_hh (3H,H), b_* (3H,), w_fc (O,H), b_fc (O,).
    Gate order (r, z, n)."""
    L = w_ih.shape[1]
    H = w_hh.shape[1]
    O = w_fc.shape[0]
    f32 = jnp.float32
    # Gate stride: if all 3 gates fit one 128-lane slab keep them packed (stride H);
    # otherwise each gate gets its own lane-aligned Hp slab (zero padding is inert).
    hk = H if 3 * H <= 128 else _round_up(H, 128)
    ng = _round_up(3 * hk, 128)
    op = _round_up(O, 128)

    wi = jnp.zeros((L, ng), weight_dtype)
    wh = jnp.zeros((hk, ng), weight_dtype)
    bi = jnp.zeros((1, ng), f32)
    bh = jnp.zeros((1, ng), f32)
    for g in range(3):
        col = g * hk
        wi = wi.at[:, col:col + H].set(w_ih[g * H:(g + 1) * H, :].T.astype(weight_dtype))
        wh = wh.at[:H, col:col + H].set(w_hh[g * H:(g + 1) * H, :].T.astype(weight_dtype))
        bi = bi.at[:, col:col + H].set(b_ih[g * H:(g + 1) * H].astype(f32))
        bh = bh.at[:, col:col + H].set(b_hh[g * H:(g + 1) * H].astype(f32))
    wf = jnp.zeros((hk, op), weight_dtype).at[:H, :O].set(w_fc.T.astype(weight_dtype))
    bf = jnp.zeros((1, op), f32).at[:, :O].set(b_fc.astype(f32))
    return dict(wi=wi, bi=bi, wh=wh, bh=bh, wf=wf, bf=bf,
                L=L, H=H, O=O, hk=hk, ng=ng, op=op)


# ----------------------------------------------------------------------------
# Forward pass.
# ----------------------------------------------------------------------------
def gru_vae_decoder_forward(z, params, *, time_chunk=32, unroll=8):
    """z: (T, B, L) float32 -> (T, B, O) float32."""
    T, B, L = z.shape
    assert L == params["L"]
    hk, ng, op, O = params["hk"], params["ng"], params["op"], params["O"]
    f32 = jnp.float32

    # Time chunking: pad T up to a multiple of the chunk instead of degrading to tiny
    # chunks for awkward T; padded steps see z = 0 and their outputs are discarded.
    tc = min(T, time_chunk)
    Tp = _round_up(T, tc)
    zp = z.astype(f32)
    if Tp != T:
        zp = jnp.pad(zp, ((0, Tp - T), (0, 0), (0, 0)))
    n_chunks = Tp // tc

    wi, bi, wh, bh, wf, bf = (params[k] for k in ("wi", "bi", "wh", "bh", "wf", "bf"))

    # Explicit VMEM budget (v7x: 64 MiB physical / 32 MiB default scoped).
    wbytes = sum(int(a.size) * a.dtype.itemsize for a in (wi, wh, wf, bi, bh, bf))
    iobytes = tc * B * (L + op) * 4
    est = 2 * (wbytes + iobytes) + B * hk * 4            # x2: double-buffered pipeline
    vmem_limit = int(min(64 * 2 ** 20, max(8 * 2 ** 20, 4 * est)))

    kernel = functools.partial(_fused_gru_decoder_kernel, hk=hk,
                               unroll=max(1, min(unroll, tc)))

    # TODO(synk): for very large H on v7x, mark the grid-invariant weight BlockSpecs with
    # pipeline_mode=pl.Buffered(1) (no double-buffering) and shard the independent batch
    # across the 2 TensorCores with a leading "parallel" grid axis.
    out = pl.pallas_call(
        kernel,
        out_shape=jax.ShapeDtypeStruct((Tp, B, op), f32),
        grid_spec=pltpu.PrefetchScalarGridSpec(
            num_scalar_prefetch=0,
            grid=(n_chunks,),
            in_specs=[
                pl.BlockSpec((tc, B, L), lambda c: (c, 0, 0)),   # z chunk
                pl.BlockSpec((L, ng), lambda c: (0, 0)),         # W_i fused
                pl.BlockSpec((1, ng), lambda c: (0, 0)),         # b_ih fused
                pl.BlockSpec((hk, ng), lambda c: (0, 0)),        # W_h fused
                pl.BlockSpec((1, ng), lambda c: (0, 0)),         # b_hh fused
                pl.BlockSpec((hk, op), lambda c: (0, 0)),        # W_fc
                pl.BlockSpec((1, op), lambda c: (0, 0)),         # b_fc
            ],
            out_specs=pl.BlockSpec((tc, B, op), lambda c: (c, 0, 0)),
            scratch_shapes=[pltpu.VMEM((B, hk), f32)],           # hidden-state carry
        ),
        compiler_params=pltpu.CompilerParams(
            dimension_semantics=("arbitrary",),                  # true recurrence
            vmem_limit_bytes=vmem_limit),
    )(zp, wi, bi, wh, bh, wf, bf)

    return out[:T, :, :O]


# ----------------------------------------------------------------------------
# Deterministic synthetic parameters + pure-JAX reference (PyTorch semantics).
# ----------------------------------------------------------------------------
def init_raw_params(key, latent_dim, hidden_dim, output_dim):
    ks = jax.random.split(key, 6)
    s = 0.1
    w_ih = jax.random.normal(ks[0], (3 * hidden_dim, latent_dim), jnp.float32) * s
    w_hh = jax.random.normal(ks[1], (3 * hidden_dim, hidden_dim), jnp.float32) * s
    b_ih = jax.random.normal(ks[2], (3 * hidden_dim,), jnp.float32) * s
    b_hh = jax.random.normal(ks[3], (3 * hidden_dim,), jnp.float32) * s
    w_fc = jax.random.normal(ks[4], (output_dim, hidden_dim), jnp.float32) * s
    b_fc = jax.random.normal(ks[5], (output_dim,), jnp.float32) * s
    return w_ih, w_hh, b_ih, b_hh, w_fc, b_fc


def reference_forward(z, raw):
    w_ih, w_hh, b_ih, b_hh, w_fc, b_fc = raw
    H = w_hh.shape[1]
    T, B, _ = z.shape
    h = jnp.zeros((B, H), jnp.float32)
    outs = []
    for t in range(T):
        x = z[t]
        gi = x @ w_ih.T + b_ih
        gh = h @ w_hh.T + b_hh
        r = jax.nn.sigmoid(gi[:, 0:H] + gh[:, 0:H])
        zg = jax.nn.sigmoid(gi[:, H:2 * H] + gh[:, H:2 * H])
        n = jnp.tanh(gi[:, 2 * H:3 * H] + r * gh[:, 2 * H:3 * H])
        h = (1.0 - zg) * n + zg * h
        outs.append(h @ w_fc.T + b_fc)
    return jnp.stack(outs, axis=0)


if __name__ == "__main__":
    T, B = 8, 2
    latent_dim, hidden_dim, output_dim = 16, 32, 24

    key = jax.random.PRNGKey(0)
    kz, kp = jax.random.split(key)
    z = jax.random.normal(kz, (T, B, latent_dim), jnp.float32)
    raw = init_raw_params(kp, latent_dim, hidden_dim, output_dim)
    ref = reference_forward(z, raw)

    # float32 weights: tight numerical check against the pure-JAX reference.
    params_f32 = prepare_params(*raw, weight_dtype=jnp.float32)
    out_f32 = jax.block_until_ready(gru_vae_decoder_forward(z, params_f32))
    assert out_f32.shape == (T, B, output_dim)
    assert jnp.allclose(out_f32, ref, atol=1e-5, rtol=1e-5), "f32 mismatch vs reference"

    # Default bfloat16 weights (MXU-native fast path): looser tolerance.
    params_bf16 = prepare_params(*raw)
    out_bf16 = jax.block_until_ready(gru_vae_decoder_forward(z, params_bf16))
    assert out_bf16.shape == (T, B, output_dim)
    assert jnp.allclose(out_bf16, ref, atol=2e-2, rtol=2e-2), "bf16 mismatch vs reference"

    print("KERNEL_OK")
</pallas_src>

<mosaic_0001>
module attributes {stable_mosaic.version = 11 : i64} {
  func.func @_fused_gru_decoder_kernel(%arg0: i32, %arg1: memref<8x2x16xf32, #tpu.memory_space<vmem>>, %arg2: memref<16x128xf32, #tpu.memory_space<vmem>>, %arg3: memref<1x128xf32, #tpu.memory_space<vmem>>, %arg4: memref<32x128xf32, #tpu.memory_space<vmem>>, %arg5: memref<1x128xf32, #tpu.memory_space<vmem>>, %arg6: memref<32x128xf32, #tpu.memory_space<vmem>>, %arg7: memref<1x128xf32, #tpu.memory_space<vmem>>, %arg8: memref<8x2x128xf32, #tpu.memory_space<vmem>>, %arg9: memref<2x32xf32, #tpu.memory_space<vmem>>) attributes {dimension_semantics = [#tpu.dimension_semantics<arbitrary>], iteration_bounds = array<i64: 1>, scalar_prefetch = 0 : i64, scratch_operands = 1 : i64, tpu.core_type = #tpu.core_type<tc>, window_params = [{transform_indices = @transform_0, window_bounds = array<i64: 8, 2, 16>}, {pipeline_mode = #tpu.pipeline_mode<synchronous>, transform_indices = @transform_1, window_bounds = array<i64: 16, 128>}, {pipeline_mode = #tpu.pipeline_mode<synchronous>, transform_indices = @transform_2, window_bounds = array<i64: 1, 128>}, {pipeline_mode = #tpu.pipeline_mode<synchronous>, transform_indices = @transform_3, window_bounds = array<i64: 32, 128>}, {pipeline_mode = #tpu.pipeline_mode<synchronous>, transform_indices = @transform_4, window_bounds = array<i64: 1, 128>}, {pipeline_mode = #tpu.pipeline_mode<synchronous>, transform_indices = @transform_5, window_bounds = array<i64: 32, 128>}, {pipeline_mode = #tpu.pipeline_mode<synchronous>, transform_indices = @transform_6, window_bounds = array<i64: 1, 128>}, {transform_indices = @transform_7, window_bounds = array<i64: 8, 2, 128>}]} {
    %c0_i32 = arith.constant 0 : i32
    %0 = arith.cmpi eq, %arg0, %c0_i32 : i32
    %1 = arith.extui %0 : i1 to i32
    %c0_i32_0 = arith.constant 0 : i32
    %2 = arith.cmpi ne, %1, %c0_i32_0 : i32
    scf.if %2 {
      %cst_88 = arith.constant 0.000000e+00 : f32
      %299 = vector.broadcast %cst_88 : f32 to vector<2x32xf32>
      %c0_89 = arith.constant 0 : index
      %c0_90 = arith.constant 0 : index
      %300 = vector.load %arg9[%c0_89, %c0_90] : memref<2x32xf32, #tpu.memory_space<vmem>>, vector<2x32xf32>
      tpu.vector_store %arg9[%c0_89, %c0_90], %299 {strides = array<i32>} : memref<2x32xf32, #tpu.memory_space<vmem>>, vector<2x32xf32>,
    } else {
    }
    %c0 = arith.constant 0 : index
    %c0_1 = arith.constant 0 : index
    %3 = vector.load %arg2[%c0, %c0_1] : memref<16x128xf32, #tpu.memory_space<vmem>>, vector<16x128xf32>
    %c0_2 = arith.constant 0 : index
    %c0_3 = arith.constant 0 : index
    %4 = vector.load %arg3[%c0_2, %c0_3] : memref<1x128xf32, #tpu.memory_space<vmem>>, vector<1x128xf32>
    %c0_4 = arith.constant 0 : index
    %c0_5 = arith.constant 0 : index
    %5 = vector.load %arg4[%c0_4, %c0_5] : memref<32x128xf32, #tpu.memory_space<vmem>>, vector<32x128xf32>
    %c0_6 = arith.constant 0 : index
    %c0_7 = arith.constant 0 : index
    %6 = vector.load %arg5[%c0_6, %c0_7] : memref<1x128xf32, #tpu.memory_space<vmem>>, vector<1x128xf32>
    %c0_8 = arith.constant 0 : index
    %c0_9 = arith.constant 0 : index
    %7 = vector.load %arg6[%c0_8, %c0_9] : memref<32x128xf32, #tpu.memory_space<vmem>>, vector<32x128xf32>
    %c0_10 = arith.constant 0 : index
    %c0_11 = arith.constant 0 : index
    %8 = vector.load %arg7[%c0_10, %c0_11] : memref<1x128xf32, #tpu.memory_space<vmem>>, vector<1x128xf32>
    %c0_12 = arith.constant 0 : index
    %c0_13 = arith.constant 0 : index
    %9 = vector.load %arg9[%c0_12, %c0_13] : memref<2x32xf32, #tpu.memory_space<vmem>>, vector<2x32xf32>
    %c0_i32_14 = arith.constant 0 : i32
    %10 = arith.index_cast %c0_i32_14 : i32 to index
    %c0_15 = arith.constant 0 : index
    %c0_16 = arith.constant 0 : index
    %11 = vector.load %arg1[%10, %c0_15, %c0_16] : memref<8x2x16xf32, #tpu.memory_space<vmem>>, vector<1x2x16xf32>
    %12 = vector.shape_cast %11 : vector<1x2x16xf32> to vector<2x16xf32>
    %cst = arith.constant dense<0.000000e+00> : vector<2x128xf32>
    %13 = tpu.matmul %12, %3, %cst {dimension_numbers = #tpu.dot_dimension_numbers<[1], [0], [0], [1], [0, 0, 1, 1], [], []>} : vector<2x16xf32>, vector<16x128xf32>, vector<2x128xf32> -> vector<2x128xf32>
    %14 = vector.broadcast %4 : vector<1x128xf32> to vector<2x128xf32>
    %15 = arith.addf %13, %14 : vector<2x128xf32>
    %cst_17 = arith.constant dense<0.000000e+00> : vector<2x128xf32>
    %16 = tpu.matmul %9, %5, %cst_17 {dimension_numbers = #tpu.dot_dimension_numbers<[1], [0], [0], [1], [0, 0, 1, 1], [], []>} : vector<2x32xf32>, vector<32x128xf32>, vector<2x128xf32> -> vector<2x128xf32>
    %17 = vector.broadcast %6 : vector<1x128xf32> to vector<2x128xf32>
    %18 = arith.addf %16, %17 : vector<2x128xf32>
    %19 = vector.extract_strided_slice %15 {offsets = [0, 0], sizes = [2, 64], strides = [1, 1]} : vector<2x128xf32> to vector<2x64xf32>
    %20 = vector.extract_strided_slice %18 {offsets = [0, 0], sizes = [2, 64], strides = [1, 1]} : vector<2x128xf32> to vector<2x64xf32>
    %21 = arith.addf %19, %20 : vector<2x64xf32>
    %22 = arith.negf %21 : vector<2x64xf32>
    %23 = math.exp %22 : vector<2x64xf32>
    %cst_18 = arith.constant 1.000000e+00 : f32
    %24 = vector.broadcast %cst_18 : f32 to vector<2x64xf32>
    %25 = arith.addf %24, %23 : vector<2x64xf32>
    %26 = arith.divf %24, %25 : vector<2x64xf32>
    %27 = vector.extract_strided_slice %26 {offsets = [0, 0], sizes = [2, 32], strides = [1, 1]} : vector<2x64xf32> to vector<2x32xf32>
    %28 = vector.extract_strided_slice %26 {offsets = [0, 32], sizes = [2, 32], strides = [1, 1]} : vector<2x64xf32> to vector<2x32xf32>
    %29 = vector.extract_strided_slice %15 {offsets = [0, 64], sizes = [2, 32], strides = [1, 1]} : vector<2x128xf32> to vector<2x32xf32>
    %30 = vector.extract_strided_slice %18 {offsets = [0, 64], sizes = [2, 32], strides = [1, 1]} : vector<2x128xf32> to vector<2x32xf32>
    %31 = arith.mulf %27, %30 : vector<2x32xf32>
    %32 = arith.addf %29, %31 : vector<2x32xf32>
    %33 = math.tanh %32 : vector<2x32xf32>
    %cst_19 = arith.constant 1.000000e+00 : f32
    %34 = vector.broadcast %cst_19 : f32 to vector<2x32xf32>
    %35 = arith.subf %34, %28 : vector<2x32xf32>
    %36 = arith.mulf %35, %33 : vector<2x32xf32>
    %37 = arith.mulf %28, %9 : vector<2x32xf32>
    %38 = arith.addf %36, %37 : vector<2x32xf32>
    %cst_20 = arith.constant dense<0.000000e+00> : vector<2x128xf32>
    %39 = tpu.matmul %38, %7, %cst_20 {dimension_numbers = #tpu.dot_dimension_numbers<[1], [0], [0], [1], [0, 0, 1, 1], [], []>} : vector<2x32xf32>, vector<32x128xf32>, vector<2x128xf32> -> vector<2x128xf32>
    %40 = vector.broadcast %8 : vector<1x128xf32> to vector<2x128xf32>
    %41 = arith.addf %39, %40 : vector<2x128xf32>
    %42 = arith.index_cast %c0_i32_14 : i32 to index
    %c0_21 = arith.constant 0 : index
    %c0_22 = arith.constant 0 : index
    %43 = vector.load %arg8[%42, %c0_21, %c0_22] : memref<8x2x128xf32, #tpu.memory_space<vmem>>, vector<1x2x128xf32>
    %44 = vector.shape_cast %43 : vector<1x2x128xf32> to vector<2x128xf32>
    %45 = vector.shape_cast %41 : vector<2x128xf32> to vector<1x2x128xf32>
    tpu.vector_store %arg8[%42, %c0_21, %c0_22], %45 {strides = array<i32>} : memref<8x2x128xf32, #tpu.memory_space<vmem>>, vector<1x2x128xf32>,
    %c1_i32 = arith.constant 1 : i32
    %46 = arith.index_cast %c1_i32 : i32 to index
    %c0_23 = arith.constant 0 : index
    %c0_24 = arith.constant 0 : index
    %47 = vector.load %arg1[%46, %c0_23, %c0_24] : memref<8x2x16xf32, #tpu.memory_space<vmem>>, vector<1x2x16xf32>
    %48 = vector.shape_cast %47 : vector<1x2x16xf32> to vector<2x16xf32>
    %cst_25 = arith.constant dense<0.000000e+00> : vector<2x128xf32>
    %49 = tpu.matmul %48, %3, %cst_25 {dimension_numbers = #tpu.dot_dimension_numbers<[1], [0], [0], [1], [0, 0, 1, 1], [], []>} : vector<2x16xf32>, vector<16x128xf32>, vector<2x128xf32> -> vector<2x128xf32>
    %50 = vector.broadcast %4 : vector<1x128xf32> to vector<2x128xf32>
    %51 = arith.addf %49, %50 : vector<2x128xf32>
    %cst_26 = arith.constant dense<0.000000e+00> : vector<2x128xf32>
    %52 = tpu.matmul %38, %5, %cst_26 {dimension_numbers = #tpu.dot_dimension_numbers<[1], [0], [0], [1], [0, 0, 1, 1], [], []>} : vector<2x32xf32>, vector<32x128xf32>, vector<2x128xf32> -> vector<2x128xf32>
    %53 = vector.broadcast %6 : vector<1x128xf32> to vector<2x128xf32>
    %54 = arith.addf %52, %53 : vector<2x128xf32>
    %55 = vector.extract_strided_slice %51 {offsets = [0, 0], sizes = [2, 64], strides = [1, 1]} : vector<2x128xf32> to vector<2x64xf32>
    %56 = vector.extract_strided_slice %54 {offsets = [0, 0], sizes = [2, 64], strides = [1, 1]} : vector<2x128xf32> to vector<2x64xf32>
    %57 = arith.addf %55, %56 : vector<2x64xf32>
    %58 = arith.negf %57 : vector<2x64xf32>
    %59 = math.exp %58 : vector<2x64xf32>
    %cst_27 = arith.constant 1.000000e+00 : f32
    %60 = vector.broadcast %cst_27 : f32 to vector<2x64xf32>
    %61 = arith.addf %60, %59 : vector<2x64xf32>
    %62 = arith.divf %60, %61 : vector<2x64xf32>
    %63 = vector.extract_strided_slice %62 {offsets = [0, 0], sizes = [2, 32], strides = [1, 1]} : vector<2x64xf32> to vector<2x32xf32>
    %64 = vector.extract_strided_slice %62 {offsets = [0, 32], sizes = [2, 32], strides = [1, 1]} : vector<2x64xf32> to vector<2x32xf32>
    %65 = vector.extract_strided_slice %51 {offsets = [0, 64], sizes = [2, 32], strides = [1, 1]} : vector<2x128xf32> to vector<2x32xf32>
    %66 = vector.extract_strided_slice %54 {offsets = [0, 64], sizes = [2, 32], strides = [1, 1]} : vector<2x128xf32> to vector<2x32xf32>
    %67 = arith.mulf %63, %66 : vector<2x32xf32>
    %68 = arith.addf %65, %67 : vector<2x32xf32>
    %69 = math.tanh %68 : vector<2x32xf32>
    %cst_28 = arith.constant 1.000000e+00 : f32
    %70 = vector.broadcast %cst_28 : f32 to vector<2x32xf32>
    %71 = arith.subf %70, %64 : vector<2x32xf32>
    %72 = arith.mulf %71, %69 : vector<2x32xf32>
    %73 = arith.mulf %64, %38 : vector<2x32xf32>
    %74 = arith.addf %72, %73 : vector<2x32xf32>
    %cst_29 = arith.constant dense<0.000000e+00> : vector<2x128xf32>
    %75 = tpu.matmul %74, %7, %cst_29 {dimension_numbers = #tpu.dot_dimension_numbers<[1], [0], [0], [1], [0, 0, 1, 1], [], []>} : vector<2x32xf32>, vector<32x128xf32>, vector<2x128xf32> -> vector<2x128xf32>
    %76 = vector.broadcast %8 : vector<1x128xf32> to vector<2x128xf32>
    %77 = arith.addf %75, %76 : vector<2x128xf32>
    %78 = arith.index_cast %c1_i32 : i32 to index
    %c0_30 = arith.constant 0 : index
    %c0_31 = arith.constant 0 : index
    %79 = vector.load %arg8[%78, %c0_30, %c0_31] : memref<8x2x128xf32, #tpu.memory_space<vmem>>, vector<1x2x128xf32>
    %80 = vector.shape_cast %79 : vector<1x2x128xf32> to vector<2x128xf32>
    %81 = vector.shape_cast %77 : vector<2x128xf32> to vector<1x2x128xf32>
    tpu.vector_store %arg8[%78, %c0_30, %c0_31], %81 {strides = array<i32>} : memref<8x2x128xf32, #tpu.memory_space<vmem>>, vector<1x2x128xf32>,
    %c2_i32 = arith.constant 2 : i32
    %82 = arith.index_cast %c2_i32 : i32 to index
    %c0_32 = arith.constant 0 : index
    %c0_33 = arith.constant 0 : index
    %83 = vector.load %arg1[%82, %c0_32, %c0_33] : memref<8x2x16xf32, #tpu.memory_space<vmem>>, vector<1x2x16xf32>
    %84 = vector.shape_cast %83 : vector<1x2x16xf32> to vector<2x16xf32>
    %cst_34 = arith.constant dense<0.000000e+00> : vector<2x128xf32>
    %85 = tpu.matmul %84, %3, %cst_34 {dimension_numbers = #tpu.dot_dimension_numbers<[1], [0], [0], [1], [0, 0, 1, 1], [], []>} : vector<2x16xf32>, vector<16x128xf32>, vector<2x128xf32> -> vector<2x128xf32>
    %86 = vector.broadcast %4 : vector<1x128xf32> to vector<2x128xf32>
    %87 = arith.addf %85, %86 : vector<2x128xf32>
    %cst_35 = arith.constant dense<0.000000e+00> : vector<2x128xf32>
    %88 = tpu.matmul %74, %5, %cst_35 {dimension_numbers = #tpu.dot_dimension_numbers<[1], [0], [0], [1], [0, 0, 1, 1], [], []>} : vector<2x32xf32>, vector<32x128xf32>, vector<2x128xf32> -> vector<2x128xf32>
    %89 = vector.broadcast %6 : vector<1x128xf32> to vector<2x128xf32>
    %90 = arith.addf %88, %89 : vector<2x128xf32>
    %91 = vector.extract_strided_slice %87 {offsets = [0, 0], sizes = [2, 64], strides = [1, 1]} : vector<2x128xf32> to vector<2x64xf32>
    %92 = vector.extract_strided_slice %90 {offsets = [0, 0], sizes = [2, 64], strides = [1, 1]} : vector<2x128xf32> to vector<2x64xf32>
    %93 = arith.addf %91, %92 : vector<2x64xf32>
    %94 = arith.negf %93 : vector<2x64xf32>
    %95 = math.exp %94 : vector<2x64xf32>
    %cst_36 = arith.constant 1.000000e+00 : f32
    %96 = vector.broadcast %cst_36 : f32 to vector<2x64xf32>
    %97 = arith.addf %96, %95 : vector<2x64xf32>
    %98 = arith.divf %96, %97 : vector<2x64xf32>
    %99 = vector.extract_strided_slice %98 {offsets = [0, 0], sizes = [2, 32], strides = [1, 1]} : vector<2x64xf32> to vector<2x32xf32>
    %100 = vector.extract_strided_slice %98 {offsets = [0, 32], sizes = [2, 32], strides = [1, 1]} : vector<2x64xf32> to vector<2x32xf32>
    %101 = vector.extract_strided_slice %87 {offsets = [0, 64], sizes = [2, 32], strides = [1, 1]} : vector<2x128xf32> to vector<2x32xf32>
    %102 = vector.extract_strided_slice %90 {offsets = [0, 64], sizes = [2, 32], strides = [1, 1]} : vector<2x128xf32> to vector<2x32xf32>
    %103 = arith.mulf %99, %102 : vector<2x32xf32>
    %104 = arith.addf %101, %103 : vector<2x32xf32>
    %105 = math.tanh %104 : vector<2x32xf32>
    %cst_37 = arith.constant 1.000000e+00 : f32
    %106 = vector.broadcast %cst_37 : f32 to vector<2x32xf32>
    %107 = arith.subf %106, %100 : vector<2x32xf32>
    %108 = arith.mulf %107, %105 : vector<2x32xf32>
    %109 = arith.mulf %100, %74 : vector<2x32xf32>
    %110 = arith.addf %108, %109 : vector<2x32xf32>
    %cst_38 = arith.constant dense<0.000000e+00> : vector<2x128xf32>
    %111 = tpu.matmul %110, %7, %cst_38 {dimension_numbers = #tpu.dot_dimension_numbers<[1], [0], [0], [1], [0, 0, 1, 1], [], []>} : vector<2x32xf32>, vector<32x128xf32>, vector<2x128xf32> -> vector<2x128xf32>
    %112 = vector.broadcast %8 : vector<1x128xf32> to vector<2x128xf32>
    %113 = arith.addf %111, %112 : vector<2x128xf32>
    %114 = arith.index_cast %c2_i32 : i32 to index
    %c0_39 = arith.constant 0 : index
    %c0_40 = arith.constant 0 : index
    %115 = vector.load %arg8[%114, %c0_39, %c0_40] : memref<8x2x128xf32, #tpu.memory_space<vmem>>, vector<1x2x128xf32>
    %116 = vector.shape_cast %115 : vector<1x2x128xf32> to vector<2x128xf32>
    %117 = vector.shape_cast %113 : vector<2x128xf32> to vector<1x2x128xf32>
    tpu.vector_store %arg8[%114, %c0_39, %c0_40], %117 {strides = array<i32>} : memref<8x2x128xf32, #tpu.memory_space<vmem>>, vector<1x2x128xf32>,
    %c3_i32 = arith.constant 3 : i32
    %118 = arith.index_cast %c3_i32 : i32 to index
    %c0_41 = arith.constant 0 : index
    %c0_42 = arith.constant 0 : index
    %119 = vector.load %arg1[%118, %c0_41, %c0_42] : memref<8x2x16xf32, #tpu.memory_space<vmem>>, vector<1x2x16xf32>
    %120 = vector.shape_cast %119 : vector<1x2x16xf32> to vector<2x16xf32>
    %cst_43 = arith.constant dense<0.000000e+00> : vector<2x128xf32>
    %121 = tpu.matmul %120, %3, %cst_43 {dimension_numbers = #tpu.dot_dimension_numbers<[1], [0], [0], [1], [0, 0, 1, 1], [], []>} : vector<2x16xf32>, vector<16x128xf32>, vector<2x128xf32> -> vector<2x128xf32>
    %122 = vector.broadcast %4 : vector<1x128xf32> to vector<2x128xf32>
    %123 = arith.addf %121, %122 : vector<2x128xf32>
    %cst_44 = arith.constant dense<0.000000e+00> : vector<2x128xf32>
    %124 = tpu.matmul %110, %5, %cst_44 {dimension_numbers = #tpu.dot_dimension_numbers<[1], [0], [0], [1], [0, 0, 1, 1], [], []>} : vector<2x32xf32>, vector<32x128xf32>, vector<2x128xf32> -> vector<2x128xf32>
    %125 = vector.broadcast %6 : vector<1x128xf32> to vector<2x128xf32>
    %126 = arith.addf %124, %125 : vector<2x128xf32>
    %127 = vector.extract_strided_slice %123 {offsets = [0, 0], sizes = [2, 64], strides = [1, 1]} : vector<2x128xf32> to vector<2x64xf32>
    %128 = vector.extract_strided_slice %126 {offsets = [0, 0], sizes = [2, 64], strides = [1, 1]} : vector<2x128xf32> to vector<2x64xf32>
    %129 = arith.addf %127, %128 : vector<2x64xf32>
    %130 = arith.negf %129 : vector<2x64xf32>
    %131 = math.exp %130 : vector<2x64xf32>
    %cst_45 = arith.constant 1.000000e+00 : f32
    %132 = vector.broadcast %cst_45 : f32 to vector<2x64xf32>
    %133 = arith.addf %132, %131 : vector<2x64xf32>
    %134 = arith.divf %132, %133 : vector<2x64xf32>
    %135 = vector.extract_strided_slice %134 {offsets = [0, 0], sizes = [2, 32], strides = [1, 1]} : vector<2x64xf32> to vector<2x32xf32>
    %136 = vector.extract_strided_slice %134 {offsets = [0, 32], sizes = [2, 32], strides = [1, 1]} : vector<2x64xf32> to vector<2x32xf32>
    %137 = vector.extract_strided_slice %123 {offsets = [0, 64], sizes = [2, 32], strides = [1, 1]} : vector<2x128xf32> to vector<2x32xf32>
    %138 = vector.extract_strided_slice %126 {offsets = [0, 64], sizes = [2, 32], strides = [1, 1]} : vector<2x128xf32> to vector<2x32xf32>
    %139 = arith.mulf %135, %138 : vector<2x32xf32>
    %140 = arith.addf %137, %139 : vector<2x32xf32>
    %141 = math.tanh %140 : vector<2x32xf32>
    %cst_46 = arith.constant 1.000000e+00 : f32
    %142 = vector.broadcast %cst_46 : f32 to vector<2x32xf32>
    %143 = arith.subf %142, %136 : vector<2x32xf32>
    %144 = arith.mulf %143, %141 : vector<2x32xf32>
    %145 = arith.mulf %136, %110 : vector<2x32xf32>
    %146 = arith.addf %144, %145 : vector<2x32xf32>
    %cst_47 = arith.constant dense<0.000000e+00> : vector<2x128xf32>
    %147 = tpu.matmul %146, %7, %cst_47 {dimension_numbers = #tpu.dot_dimension_numbers<[1], [0], [0], [1], [0, 0, 1, 1], [], []>} : vector<2x32xf32>, vector<32x128xf32>, vector<2x128xf32> -> vector<2x128xf32>
    %148 = vector.broadcast %8 : vector<1x128xf32> to vector<2x128xf32>
    %149 = arith.addf %147, %148 : vector<2x128xf32>
    %150 = arith.index_cast %c3_i32 : i32 to index
    %c0_48 = arith.constant 0 : index
    %c0_49 = arith.constant 0 : index
    %151 = vector.load %arg8[%150, %c0_48, %c0_49] : memref<8x2x128xf32, #tpu.memory_space<vmem>>, vector<1x2x128xf32>
    %152 = vector.shape_cast %151 : vector<1x2x128xf32> to vector<2x128xf32>
    %153 = vector.shape_cast %149 : vector<2x128xf32> to vector<1x2x128xf32>
    tpu.vector_store %arg8[%150, %c0_48, %c0_49], %153 {strides = array<i32>} : memref<8x2x128xf32, #tpu.memory_space<vmem>>, vector<1x2x128xf32>,
    %c4_i32 = arith.constant 4 : i32
    %154 = arith.index_cast %c4_i32 : i32 to index
    %c0_50 = arith.constant 0 : index
    %c0_51 = arith.constant 0 : index
    %155 = vector.load %arg1[%154, %c0_50, %c0_51] : memref<8x2x16xf32, #tpu.memory_space<vmem>>, vector<1x2x16xf32>
    %156 = vector.shape_cast %155 : vector<1x2x16xf32> to vector<2x16xf32>
    %cst_52 = arith.constant dense<0.000000e+00> : vector<2x128xf32>
    %157 = tpu.matmul %156, %3, %cst_52 {dimension_numbers = #tpu.dot_dimension_numbers<[1], [0], [0], [1], [0, 0, 1, 1], [], []>} : vector<2x16xf32>, vector<16x128xf32>, vector<2x128xf32> -> vector<2x128xf32>
    %158 = vector.broadcast %4 : vector<1x128xf32> to vector<2x128xf32>
    %159 = arith.addf %157, %158 : vector<2x128xf32>
    %cst_53 = arith.constant dense<0.000000e+00> : vector<2x128xf32>
    %160 = tpu.matmul %146, %5, %cst_53 {dimension_numbers = #tpu.dot_dimension_numbers<[1], [0], [0], [1], [0, 0, 1, 1], [], []>} : vector<2x32xf32>, vector<32x128xf32>, vector<2x128xf32> -> vector<2x128xf32>
    %161 = vector.broadcast %6 : vector<1x128xf32> to vector<2x128xf32>
    %162 = arith.addf %160, %161 : vector<2x128xf32>
    %163 = vector.extract_strided_slice %159 {offsets = [0, 0], sizes = [2, 64], strides = [1, 1]} : vector<2x128xf32> to vector<2x64xf32>
    %164 = vector.extract_strided_slice %162 {offsets = [0, 0], sizes = [2, 64], strides = [1, 1]} : vector<2x128xf32> to vector<2x64xf32>
    %165 = arith.addf %163, %164 : vector<2x64xf32>
    %166 = arith.negf %165 : vector<2x64xf32>
    %167 = math.exp %166 : vector<2x64xf32>
    %cst_54 = arith.constant 1.000000e+00 : f32
    %168 = vector.broadcast %cst_54 : f32 to vector<2x64xf32>
    %169 = arith.addf %168, %167 : vector<2x64xf32>
    %170 = arith.divf %168, %169 : vector<2x64xf32>
    %171 = vector.extract_strided_slice %170 {offsets = [0, 0], sizes = [2, 32], strides = [1, 1]} : vector<2x64xf32> to vector<2x32xf32>
    %172 = vector.extract_strided_slice %170 {offsets = [0, 32], sizes = [2, 32], strides = [1, 1]} : vector<2x64xf32> to vector<2x32xf32>
    %173 = vector.extract_strided_slice %159 {offsets = [0, 64], sizes = [2, 32], strides = [1, 1]} : vector<2x128xf32> to vector<2x32xf32>
    %174 = vector.extract_strided_slice %162 {offsets = [0, 64], sizes = [2, 32], strides = [1, 1]} : vector<2x128xf32> to vector<2x32xf32>
    %175 = arith.mulf %171, %174 : vector<2x32xf32>
    %176 = arith.addf %173, %175 : vector<2x32xf32>
    %177 = math.tanh %176 : vector<2x32xf32>
    %cst_55 = arith.constant 1.000000e+00 : f32
    %178 = vector.broadcast %cst_55 : f32 to vector<2x32xf32>
    %179 = arith.subf %178, %172 : vector<2x32xf32>
    %180 = arith.mulf %179, %177 : vector<2x32xf32>
    %181 = arith.mulf %172, %146 : vector<2x32xf32>
    %182 = arith.addf %180, %181 : vector<2x32xf32>
    %cst_56 = arith.constant dense<0.000000e+00> : vector<2x128xf32>
    %183 = tpu.matmul %182, %7, %cst_56 {dimension_numbers = #tpu.dot_dimension_numbers<[1], [0], [0], [1], [0, 0, 1, 1], [], []>} : vector<2x32xf32>, vector<32x128xf32>, vector<2x128xf32> -> vector<2x128xf32>
    %184 = vector.broadcast %8 : vector<1x128xf32> to vector<2x128xf32>
    %185 = arith.addf %183, %184 : vector<2x128xf32>
    %186 = arith.index_cast %c4_i32 : i32 to index
    %c0_57 = arith.constant 0 : index
    %c0_58 = arith.constant 0 : index
    %187 = vector.load %arg8[%186, %c0_57, %c0_58] : memref<8x2x128xf32, #tpu.memory_space<vmem>>, vector<1x2x128xf32>
    %188 = vector.shape_cast %187 : vector<1x2x128xf32> to vector<2x128xf32>
    %189 = vector.shape_cast %185 : vector<2x128xf32> to vector<1x2x128xf32>
    tpu.vector_store %arg8[%186, %c0_57, %c0_58], %189 {strides = array<i32>} : memref<8x2x128xf32, #tpu.memory_space<vmem>>, vector<1x2x128xf32>,
    %c5_i32 = arith.constant 5 : i32
    %190 = arith.index_cast %c5_i32 : i32 to index
    %c0_59 = arith.constant 0 : index
    %c0_60 = arith.constant 0 : index
    %191 = vector.load %arg1[%190, %c0_59, %c0_60] : memref<8x2x16xf32, #tpu.memory_space<vmem>>, vector<1x2x16xf32>
    %192 = vector.shape_cast %191 : vector<1x2x16xf32> to vector<2x16xf32>
    %cst_61 = arith.constant dense<0.000000e+00> : vector<2x128xf32>
    %193 = tpu.matmul %192, %3, %cst_61 {dimension_numbers = #tpu.dot_dimension_numbers<[1], [0], [0], [1], [0, 0, 1, 1], [], []>} : vector<2x16xf32>, vector<16x128xf32>, vector<2x128xf32> -> vector<2x128xf32>
    %194 = vector.broadcast %4 : vector<1x128xf32> to vector<2x128xf32>
    %195 = arith.addf %193, %194 : vector<2x128xf32>
    %cst_62 = arith.constant dense<0.000000e+00> : vector<2x128xf32>
    %196 = tpu.matmul %182, %5, %cst_62 {dimension_numbers = #tpu.dot_dimension_numbers<[1], [0], [0], [1], [0, 0, 1, 1], [], []>} : vector<2x32xf32>, vector<32x128xf32>, vector<2x128xf32> -> vector<2x128xf32>
    %197 = vector.broadcast %6 : vector<1x128xf32> to vector<2x128xf32>
    %198 = arith.addf %196, %197 : vector<2x128xf32>
    %199 = vector.extract_strided_slice %195 {offsets = [0, 0], sizes = [2, 64], strides = [1, 1]} : vector<2x128xf32> to vector<2x64xf32>
    %200 = vector.extract_strided_slice %198 {offsets = [0, 0], sizes = [2, 64], strides = [1, 1]} : vector<2x128xf32> to vector<2x64xf32>
    %201 = arith.addf %199, %200 : vector<2x64xf32>
    %202 = arith.negf %201 : vector<2x64xf32>
    %203 = math.exp %202 : vector<2x64xf32>
    %cst_63 = arith.constant 1.000000e+00 : f32
    %204 = vector.broadcast %cst_63 : f32 to vector<2x64xf32>
    %205 = arith.addf %204, %203 : vector<2x64xf32>
    %206 = arith.divf %204, %205 : vector<2x64xf32>
    %207 = vector.extract_strided_slice %206 {offsets = [0, 0], sizes = [2, 32], strides = [1, 1]} : vector<2x64xf32> to vector<2x32xf32>
    %208 = vector.extract_strided_slice %206 {offsets = [0, 32], sizes = [2, 32], strides = [1, 1]} : vector<2x64xf32> to vector<2x32xf32>
    %209 = vector.extract_strided_slice %195 {offsets = [0, 64], sizes = [2, 32], strides = [1, 1]} : vector<2x128xf32> to vector<2x32xf32>
    %210 = vector.extract_strided_slice %198 {offsets = [0, 64], sizes = [2, 32], strides = [1, 1]} : vector<2x128xf32> to vector<2x32xf32>
    %211 = arith.mulf %207, %210 : vector<2x32xf32>
    %212 = arith.addf %209, %211 : vector<2x32xf32>
    %213 = math.tanh %212 : vector<2x32xf32>
    %cst_64 = arith.constant 1.000000e+00 : f32
    %214 = vector.broadcast %cst_64 : f32 to vector<2x32xf32>
    %215 = arith.subf %214, %208 : vector<2x32xf32>
    %216 = arith.mulf %215, %213 : vector<2x32xf32>
    %217 = arith.mulf %208, %182 : vector<2x32xf32>
    %218 = arith.addf %216, %217 : vector<2x32xf32>
    %cst_65 = arith.constant dense<0.000000e+00> : vector<2x128xf32>
    %219 = tpu.matmul %218, %7, %cst_65 {dimension_numbers = #tpu.dot_dimension_numbers<[1], [0], [0], [1], [0, 0, 1, 1], [], []>} : vector<2x32xf32>, vector<32x128xf32>, vector<2x128xf32> -> vector<2x128xf32>
    %220 = vector.broadcast %8 : vector<1x128xf32> to vector<2x128xf32>
    %221 = arith.addf %219, %220 : vector<2x128xf32>
    %222 = arith.index_cast %c5_i32 : i32 to index
    %c0_66 = arith.constant 0 : index
    %c0_67 = arith.constant 0 : index
    %223 = vector.load %arg8[%222, %c0_66, %c0_67] : memref<8x2x128xf32, #tpu.memory_space<vmem>>, vector<1x2x128xf32>
    %224 = vector.shape_cast %223 : vector<1x2x128xf32> to vector<2x128xf32>
    %225 = vector.shape_cast %221 : vector<2x128xf32> to vector<1x2x128xf32>
    tpu.vector_store %arg8[%222, %c0_66, %c0_67], %225 {strides = array<i32>} : memref<8x2x128xf32, #tpu.memory_space<vmem>>, vector<1x2x128xf32>,
    %c6_i32 = arith.constant 6 : i32
    %226 = arith.index_cast %c6_i32 : i32 to index
    %c0_68 = arith.constant 0 : index
    %c0_69 = arith.constant 0 : index
    %227 = vector.load %arg1[%226, %c0_68, %c0_69] : memref<8x2x16xf32, #tpu.memory_space<vmem>>, vector<1x2x16xf32>
    %228 = vector.shape_cast %227 : vector<1x2x16xf32> to vector<2x16xf32>
    %cst_70 = arith.constant dense<0.000000e+00> : vector<2x128xf32>
    %229 = tpu.matmul %228, %3, %cst_70 {dimension_numbers = #tpu.dot_dimension_numbers<[1], [0], [0], [1], [0, 0, 1, 1], [], []>} : vector<2x16xf32>, vector<16x128xf32>, vector<2x128xf32> -> vector<2x128xf32>
    %230 = vector.broadcast %4 : vector<1x128xf32> to vector<2x128xf32>
    %231 = arith.addf %229, %230 : vector<2x128xf32>
    %cst_71 = arith.constant dense<0.000000e+00> : vector<2x128xf32>
    %232 = tpu.matmul %218, %5, %cst_71 {dimension_numbers = #tpu.dot_dimension_numbers<[1], [0], [0], [1], [0, 0, 1, 1], [], []>} : vector<2x32xf32>, vector<32x128xf32>, vector<2x128xf32> -> vector<2x128xf32>
    %233 = vector.broadcast %6 : vector<1x128xf32> to vector<2x128xf32>
    %234 = arith.addf %232, %233 : vector<2x128xf32>
    %235 = vector.extract_strided_slice %231 {offsets = [0, 0], sizes = [2, 64], strides = [1, 1]} : vector<2x128xf32> to vector<2x64xf32>
    %236 = vector.extract_strided_slice %234 {offsets = [0, 0], sizes = [2, 64], strides = [1, 1]} : vector<2x128xf32> to vector<2x64xf32>
    %237 = arith.addf %235, %236 : vector<2x64xf32>
    %238 = arith.negf %237 : vector<2x64xf32>
    %239 = math.exp %238 : vector<2x64xf32>
    %cst_72 = arith.constant 1.000000e+00 : f32
    %240 = vector.broadcast %cst_72 : f32 to vector<2x64xf32>
    %241 = arith.addf %240, %239 : vector<2x64xf32>
    %242 = arith.divf %240, %241 : vector<2x64xf32>
    %243 = vector.extract_strided_slice %242 {offsets = [0, 0], sizes = [2, 32], strides = [1, 1]} : vector<2x64xf32> to vector<2x32xf32>
    %244 = vector.extract_strided_slice %242 {offsets = [0, 32], sizes = [2, 32], strides = [1, 1]} : vector<2x64xf32> to vector<2x32xf32>
    %245 = vector.extract_strided_slice %231 {offsets = [0, 64], sizes = [2, 32], strides = [1, 1]} : vector<2x128xf32> to vector<2x32xf32>
    %246 = vector.extract_strided_slice %234 {offsets = [0, 64], sizes = [2, 32], strides = [1, 1]} : vector<2x128xf32> to vector<2x32xf32>
    %247 = arith.mulf %243, %246 : vector<2x32xf32>
    %248 = arith.addf %245, %247 : vector<2x32xf32>
    %249 = math.tanh %248 : vector<2x32xf32>
    %cst_73 = arith.constant 1.000000e+00 : f32
    %250 = vector.broadcast %cst_73 : f32 to vector<2x32xf32>
    %251 = arith.subf %250, %244 : vector<2x32xf32>
    %252 = arith.mulf %251, %249 : vector<2x32xf32>
    %253 = arith.mulf %244, %218 : vector<2x32xf32>
    %254 = arith.addf %252, %253 : vector<2x32xf32>
    %cst_74 = arith.constant dense<0.000000e+00> : vector<2x128xf32>
    %255 = tpu.matmul %254, %7, %cst_74 {dimension_numbers = #tpu.dot_dimension_numbers<[1], [0], [0], [1], [0, 0, 1, 1], [], []>} : vector<2x32xf32>, vector<32x128xf32>, vector<2x128xf32> -> vector<2x128xf32>
    %256 = vector.broadcast %8 : vector<1x128xf32> to vector<2x128xf32>
    %257 = arith.addf %255, %256 : vector<2x128xf32>
    %258 = arith.index_cast %c6_i32 : i32 to index
    %c0_75 = arith.constant 0 : index
    %c0_76 = arith.constant 0 : index
    %259 = vector.load %arg8[%258, %c0_75, %c0_76] : memref<8x2x128xf32, #tpu.memory_space<vmem>>, vector<1x2x128xf32>
    %260 = vector.shape_cast %259 : vector<1x2x128xf32> to vector<2x128xf32>
    %261 = vector.shape_cast %257 : vector<2x128xf32> to vector<1x2x128xf32>
    tpu.vector_store %arg8[%258, %c0_75, %c0_76], %261 {strides = array<i32>} : memref<8x2x128xf32, #tpu.memory_space<vmem>>, vector<1x2x128xf32>,
    %c7_i32 = arith.constant 7 : i32
    %262 = arith.index_cast %c7_i32 : i32 to index
    %c0_77 = arith.constant 0 : index
    %c0_78 = arith.constant 0 : index
    %263 = vector.load %arg1[%262, %c0_77, %c0_78] : memref<8x2x16xf32, #tpu.memory_space<vmem>>, vector<1x2x16xf32>
    %264 = vector.shape_cast %263 : vector<1x2x16xf32> to vector<2x16xf32>
    %cst_79 = arith.constant dense<0.000000e+00> : vector<2x128xf32>
    %265 = tpu.matmul %264, %3, %cst_79 {dimension_numbers = #tpu.dot_dimension_numbers<[1], [0], [0], [1], [0, 0, 1, 1], [], []>} : vector<2x16xf32>, vector<16x128xf32>, vector<2x128xf32> -> vector<2x128xf32>
    %266 = vector.broadcast %4 : vector<1x128xf32> to vector<2x128xf32>
    %267 = arith.addf %265, %266 : vector<2x128xf32>
    %cst_80 = arith.constant dense<0.000000e+00> : vector<2x128xf32>
    %268 = tpu.matmul %254, %5, %cst_80 {dimension_numbers = #tpu.dot_dimension_numbers<[1], [0], [0], [1], [0, 0, 1, 1], [], []>} : vector<2x32xf32>, vector<32x128xf32>, vector<2x128xf32> -> vector<2x128xf32>
    %269 = vector.broadcast %6 : vector<1x128xf32> to vector<2x128xf32>
    %270 = arith.addf %268, %269 : vector<2x128xf32>
    %271 = vector.extract_strided_slice %267 {offsets = [0, 0], sizes = [2, 64], strides = [1, 1]} : vector<2x128xf32> to vector<2x64xf32>
    %272 = vector.extract_strided_slice %270 {offsets = [0, 0], sizes = [2, 64], strides = [1, 1]} : vector<2x128xf32> to vector<2x64xf32>
    %273 = arith.addf %271, %272 : vector<2x64xf32>
    %274 = arith.negf %273 : vector<2x64xf32>
    %275 = math.exp %274 : vector<2x64xf32>
    %cst_81 = arith.constant 1.000000e+00 : f32
    %276 = vector.broadcast %cst_81 : f32 to vector<2x64xf32>
    %277 = arith.addf %276, %275 : vector<2x64xf32>
    %278 = arith.divf %276, %277 : vector<2x64xf32>
    %279 = vector.extract_strided_slice %278 {offsets = [0, 0], sizes = [2, 32], strides = [1, 1]} : vector<2x64xf32> to vector<2x32xf32>
    %280 = vector.extract_strided_slice %278 {offsets = [0, 32], sizes = [2, 32], strides = [1, 1]} : vector<2x64xf32> to vector<2x32xf32>
    %281 = vector.extract_strided_slice %267 {offsets = [0, 64], sizes = [2, 32], strides = [1, 1]} : vector<2x128xf32> to vector<2x32xf32>
    %282 = vector.extract_strided_slice %270 {offsets = [0, 64], sizes = [2, 32], strides = [1, 1]} : vector<2x128xf32> to vector<2x32xf32>
    %283 = arith.mulf %279, %282 : vector<2x32xf32>
    %284 = arith.addf %281, %283 : vector<2x32xf32>
    %285 = math.tanh %284 : vector<2x32xf32>
    %cst_82 = arith.constant 1.000000e+00 : f32
    %286 = vector.broadcast %cst_82 : f32 to vector<2x32xf32>
    %287 = arith.subf %286, %280 : vector<2x32xf32>
    %288 = arith.mulf %287, %285 : vector<2x32xf32>
    %289 = arith.mulf %280, %254 : vector<2x32xf32>
    %290 = arith.addf %288, %289 : vector<2x32xf32>
    %cst_83 = arith.constant dense<0.000000e+00> : vector<2x128xf32>
    %291 = tpu.matmul %290, %7, %cst_83 {dimension_numbers = #tpu.dot_dimension_numbers<[1], [0], [0], [1], [0, 0, 1, 1], [], []>} : vector<2x32xf32>, vector<32x128xf32>, vector<2x128xf32> -> vector<2x128xf32>
    %292 = vector.broadcast %8 : vector<1x128xf32> to vector<2x128xf32>
    %293 = arith.addf %291, %292 : vector<2x128xf32>
    %294 = arith.index_cast %c7_i32 : i32 to index
    %c0_84 = arith.constant 0 : index
    %c0_85 = arith.constant 0 : index
    %295 = vector.load %arg8[%294, %c0_84, %c0_85] : memref<8x2x128xf32, #tpu.memory_space<vmem>>, vector<1x2x128xf32>
    %296 = vector.shape_cast %295 : vector<1x2x128xf32> to vector<2x128xf32>
    %297 = vector.shape_cast %293 : vector<2x128xf32> to vector<1x2x128xf32>
    tpu.vector_store %arg8[%294, %c0_84, %c0_85], %297 {strides = array<i32>} : memref<8x2x128xf32, #tpu.memory_space<vmem>>, vector<1x2x128xf32>,
    %c8_i32 = arith.constant 8 : i32
    %c0_86 = arith.constant 0 : index
    %c0_87 = arith.constant 0 : index
    %298 = vector.load %arg9[%c0_86, %c0_87] : memref<2x32xf32, #tpu.memory_space<vmem>>, vector<2x32xf32>
    tpu.vector_store %arg9[%c0_86, %c0_87], %290 {strides = array<i32>} : memref<2x32xf32, #tpu.memory_space<vmem>>, vector<2x32xf32>,
    return
  }
  func.func @transform_0(%arg0: i32) -> (i32, i32, i32) {
    %c0_i32 = arith.constant 0 : i32
    %c0_i32_0 = arith.constant 0 : i32
    %c0_i32_1 = arith.constant 0 : i32
    return %arg0, %c0_i32, %c0_i32_0 : i32, i32, i32
  }
  func.func @transform_1(%arg0: i32) -> (i32, i32) {
    %c0_i32 = arith.constant 0 : i32
    %c0_i32_0 = arith.constant 0 : i32
    %c0_i32_1 = arith.constant 0 : i32
    return %c0_i32, %c0_i32_0 : i32, i32
  }
  func.func @transform_2(%arg0: i32) -> (i32, i32) {
    %c0_i32 = arith.constant 0 : i32
    %c0_i32_0 = arith.constant 0 : i32
    %c0_i32_1 = arith.constant 0 : i32
    return %c0_i32, %c0_i32_0 : i32, i32
  }
  func.func @transform_3(%arg0: i32) -> (i32, i32) {
    %c0_i32 = arith.constant 0 : i32
    %c0_i32_0 = arith.constant 0 : i32
    %c0_i32_1 = arith.constant 0 : i32
    return %c0_i32, %c0_i32_0 : i32, i32
  }
  func.func @transform_4(%arg0: i32) -> (i32, i32) {
    %c0_i32 = arith.constant 0 : i32
    %c0_i32_0 = arith.constant 0 : i32
    %c0_i32_1 = arith.constant 0 : i32
    return %c0_i32, %c0_i32_0 : i32, i32
  }
  func.func @transform_5(%arg0: i32) -> (i32, i32) {
    %c0_i32 = arith.constant 0 : i32
    %c0_i32_0 = arith.constant 0 : i32
    %c0_i32_1 = arith.constant 0 : i32
    return %c0_i32, %c0_i32_0 : i32, i32
  }
  func.func @transform_6(%arg0: i32) -> (i32, i32) {
    %c0_i32 = arith.constant 0 : i32
    %c0_i32_0 = arith.constant 0 : i32
    %c0_i32_1 = arith.constant 0 : i32
    return %c0_i32, %c0_i32_0 : i32, i32
  }
  func.func @transform_7(%arg0: i32) -> (i32, i32, i32) {
    %c0_i32 = arith.constant 0 : i32
    %c0_i32_0 = arith.constant 0 : i32
    %c0_i32_1 = arith.constant 0 : i32
    return %arg0, %c0_i32, %c0_i32_0 : i32, i32, i32
  }
}

</mosaic_0001>

<bundles_post_ra>
// kernel: tpu_custom_call.1
= control target key start
LH: loop header
LB: loop body
LE: loop exit
PB: predicated region body
PF: predicated region fallthrough
CT: control target
= control target key end

     0   :  { %12 = vsyncpa [#allocation4], 0  ;;  %s1531_s0 = inlined_call_operand.hbm [shape: f32[8,2,16], index: 0, kind: input, shape index: {}]   ;;  %s1532_s1 = inlined_call_operand.hbm [shape: f32[16,128], index: 1, kind: input, shape index: {}]   ;;  %s1533_s2 = inlined_call_operand.vmem [shape: f32[1,128], index: 2, kind: input, shape index: {}]   ;;  %s1534_s3 = inlined_call_operand.hbm [shape: f32[32,128], index: 3, kind: input, shape index: {}]   ;;  %s1535_s4 = inlined_call_operand.vmem [shape: f32[1,128], index: 4, kind: input, shape index: {}]   ;;  %s1536_s5 = inlined_call_operand.hbm [shape: f32[32,128], index: 5, kind: input, shape index: {}]   ;;  %s1537_s6 = inlined_call_operand.vmem [shape: f32[1,128], index: 6, kind: input, shape index: {}]   ;;  %s1538_s7 = inlined_call_operand.hbm [shape: f32[8,2,128], index: 7, kind: output, shape index: {}]  }
   0x1   :  { %13 = vsyncpa [#allocation7], 0 }
   0x2   :  { %14 = vsyncpa [#allocation10], 0  ;;  %s33_s26 = sshll.u32 %s1532_s1, 4  ;;  %s34_s26 = int_to_ptr.hbm [resolvable:$true] %s33_s26 }
   0x3   :  { %15 = vsyncpa [#allocation5], 0  ;;  %s1260_s27 = smov [#allocation6]   ;;  %s20_s8 = sshll.u32 %s1531_s0, 4  ;;  %s21_s8 = int_to_ptr.hbm [resolvable:$true] %s20_s8 }
   0x4   :  { %s35_s28 = sshll.u32 %s1260_s27, 4  ;;  %s1261_s9 = smov 128   ;;  %s36_s28 = int_to_ptr.vmem [resolvable:$true] %s35_s28 }
   0x5   :  { %s1262_s10 = smov 8   ;;  %s1263_s11 = smov [#allocation3]  }
   0x6   :  { %41 = dma.hbm_to_vmem [thread:$0]  %s34_s26, 256, %s36_s28, [#allocation7], %s1261_s9, %s1261_s9, %s1262_s10  }
   0x7   :  { %s22_s12 = sshll.u32 %s1263_s11, 4  ;;  %s1264_s13 = smov 32   ;;  %s23_s12 = int_to_ptr.vmem [resolvable:$true] %s22_s12 }
   0x8   :  { %s1265_s14 = smov 2   ;;  %s48_s16 = sshll.u32 %s1534_s3, 4  ;;  %s49_s16 = int_to_ptr.hbm [resolvable:$true] %s48_s16 }
   0x9   :  { %28 = dma.hbm_to_vmem [thread:$0]  %s21_s8, 256, %s23_s12, [#allocation4], %s1264_s13, %s1264_s13, %s1265_s14  }
   0xa   :  { %s1266_s17 = smov [#allocation8]   ;;  %s63_s20 = sshll.u32 %s1536_s5, 4  ;;  %s64_s20 = int_to_ptr.hbm [resolvable:$true] %s63_s20 }
   0xb   :  { %s50_s0 = sshll.u32 %s1266_s17, 4  ;;  %s1267_s21 = smov [#allocation9]   ;;  %s51_s0 = int_to_ptr.vmem [resolvable:$true] %s50_s0 }
   0xc   :  { %56 = dma.hbm_to_vmem [thread:$0]  %s49_s16, 512, %s51_s0, [#allocation7], %s1261_s9, %s1261_s9, %s1262_s10  }
   0xd   :  { %s65_s22 = sshll.u32 %s1267_s21, 4  ;;  %s66_s22 = int_to_ptr.vmem [resolvable:$true] %s65_s22 }
   0xe   :  { %71 = dma.hbm_to_vmem [thread:$0]  %s64_s20, 512, %s66_s22, [#allocation10], %s1261_s9, %s1261_s9, %s1262_s10  }
   0xf   :  { %1252 = dma.done.wait [#allocation4], 256  }
  0x10   :  { %1253 = vsyncadd [#allocation4], 4294967040 }
  0x11   :  { %1254 = dma.done.wait [#allocation7], 768  }
  0x12   :  { %1255 = vsyncadd [#allocation7], 4294966528 }
  0x13   :  { %1256 = dma.done.wait [#allocation10], 512  }
  0x14   :  { %1257 = vsyncadd [#allocation10], 4294966784  ;;  %vm94_vm0 = vcmask 254976   ;;  %v1268_v0 = vmov 0.0   ;;  %v1328_v1 = vld [vmem:[#allocation8 + $0x18] sm:$0xff]  ;;  %v1330_v2 = vld [vmem:[#allocation8 + $0x10] sm:$0xff] }
  0x15   :  { %95 = vst.msk [vmem:[#allocation2] sm:$0x3] %vm94_vm0, %v1268_v0  ;;  %v1332_v3 = vld [vmem:[#allocation6 + $0x8] sm:$0xff]  ;;  %157 = vmatpush.msra.mxu1 %v1328_v1  ;;  %v1336_v4 = vld [vmem:[#allocation6] sm:$0xff]  ;;  %vm114_vm1 = vcmask 130048   ;;  %v1338_v5 = vld [vmem:[#allocation8 + $0x8] sm:$0xff] }
  0x16   :  { %132 = vmatpush.msra.mxu0 %v1332_v3  ;;  %v110_v6 = vld [vmem:[#allocation3] sm:$0x3]  ;;  %255 = vmatpush.msra.mxu3 %v1332_v3  ;;  %vm141_vm2 = vcmask 261120   ;;  %v1363_v9 = vld [vmem:[%s1535_s4] ss:$0 sm:$0xff]  ;;  %s1269_s23 = smov 64  }
  0x17   :  { %158 = vmatpush.msra.mxu1 %v1330_v2  ;;  %v1343_v7 = vld [vmem:[#allocation8] sm:$0xff]  ;;  %v1370_v12 = vld [vmem:[%s1533_s2] ss:$0 sm:$0xff]  ;;  %s1270_s2 = smov 96   ;;  %v1378_v36 = vld [vmem:[#allocation9 + $0x10] sm:$0xff]  ;;  %s1022_s30 = sshll.u32 %s1538_s7, 4  ;;  %s1023_s30 = int_to_ptr.hbm [resolvable:$true] %s1022_s30 }
  0x18   :  { %133 = vmatpush.msra.mxu0 %v1336_v4  ;;  %256 = vmatpush.msra.mxu3 %v1336_v4  ;;  %v1376_v34 = vld [vmem:[#allocation9 + $0x18] sm:$0xff]  ;;  %v237_v35 = vld [vmem:[#allocation3 + $0x2] sm:$0x3]  ;;  %v1382_v37 = vld [vmem:[#allocation9 + $0x8] sm:$0xff] }
  0x19   :  { %1037 = vmatmul.msk.f32.vlgmr.msra.gmra.mxu0 %vm114_vm1, %v110_v6  ;;  %159 = vmatpush.msra.mxu1 %v1338_v5  ;;  %v1387_v38 = vld [vmem:[#allocation9] sm:$0xff]  ;;  %v1417_v48 = vld [vmem:[%s1537_s6] ss:$0 sm:$0xff]  ;;  %s1271_s6 = smov [#allocation11]  }
  0x1a   :  { %273 = vmatpush.msrb.mxu0 %v1328_v1  ;;  %227 = vmatpush.msra.mxu2 %v1376_v34  ;;  %s1020_s27 = sshll.u32 %s1271_s6, 4  ;;  %s1021_s27 = int_to_ptr.vmem [resolvable:$true] %s1020_s27 }
  0x1b   :  { %160 = vmatpush.msra.mxu1 %v1343_v7  ;;  %1041 = vmatmul.msk.f32.vlgmr.msra.gmra.mxu3 %vm114_vm1, %v237_v35 }
  0x1c   :  { %v109_v8 = vld [vmem:[#allocation2] sm:$0x3]  ;;  %274 = vmatpush.msrb.mxu0 %v1330_v2  ;;  %337 = vmatpush.msrb.mxu3 %v1376_v34 }
  0x1d   :  { %1038 = vmatmul.msk.f32.vlgmr.msra.gmra.mxu1 %vm141_vm2, %v109_v8  ;;  %228 = vmatpush.msra.mxu2 %v1378_v36 }
  0x1e   :  { %275 = vmatpush.msrb.mxu0 %v1338_v5  ;;  %366 = vmatpush.msrb.mxu1 %v1332_v3 }
  0x1f   :  { %338 = vmatpush.msrb.mxu3 %v1378_v36  ;;  %229 = vmatpush.msra.mxu2 %v1382_v37 }
  0x20   :  { %276 = vmatpush.msrb.mxu0 %v1343_v7  ;;  %367 = vmatpush.msrb.mxu1 %v1336_v4 }
  0x21   :  { %339 = vmatpush.msrb.mxu3 %v1382_v37  ;;  %230 = vmatpush.msra.mxu2 %v1387_v38 }
  0x22   :  { %495 = vmatpush.msra.mxu1 %v1328_v1  ;;  %448 = vmatpush.msra.mxu0 %v1376_v34 }
  0x23   :  { %384 = vmatpush.msrb.mxu2 %v1328_v1  ;;  %340 = vmatpush.msrb.mxu3 %v1387_v38 }
  0x24   :  { %496 = vmatpush.msra.mxu1 %v1330_v2  ;;  %449 = vmatpush.msra.mxu0 %v1378_v36 }
  0x25   :  { %477 = vmatpush.msra.mxu3 %v1332_v3  ;;  %385 = vmatpush.msrb.mxu2 %v1330_v2 }
  0x26   :  { %497 = vmatpush.msra.mxu1 %v1338_v5  ;;  %450 = vmatpush.msra.mxu0 %v1382_v37 }
  0x27   :  { %478 = vmatpush.msra.mxu3 %v1336_v4  ;;  %386 = vmatpush.msrb.mxu2 %v1338_v5 }
  0x28   :  { %498 = vmatpush.msra.mxu1 %v1343_v7  ;;  %451 = vmatpush.msra.mxu0 %v1387_v38 }
  0x29   :  { %387 = vmatpush.msrb.mxu2 %v1343_v7 }
  0x96   :  { %v135_v13 = vpop.f32.mrf.mxu0 }
  0x97   :  { %v136_v14 = vadd.f32 %v1370_v12, %v135_v13 }
  0x9a   :  { %v162_v10 = vpop.f32.mrf.mxu1 }
  0x9b   :  { %v163_v11 = vadd.f32 %v1363_v9, %v162_v10 }
  0x9d   :  { %186 = vrot.lane.b32.xlu0 %v163_v11, %s1269_s23  ;;  %v165_v15 = vadd.f32 %v163_v11, %v136_v14 }
  0x9e   :  { %v258_v51 = vpop.f32.mrf.mxu3 }
  0x9f   :  { %v1039_v16 = vmul.f32 -1.442695, %v165_v15  ;;  %v259_v52 = vadd.f32 %v1370_v12, %v258_v51 }
  0xa1   :  { %1084 = vpow2.f32 %v1039_v16 }
  0xa7   :  { %v1085_v17 = vpop.eup %1084 }
  0xa8   :  { %v169_v18 = vadd.f32 1.0, %v1085_v17 }
  0xaa   :  { %1086 = vrcp.f32 %v169_v18  ;;  %v181_v24 = vand.u32 2147483648, %v169_v18  ;;  %vm175_vm4 = vweird.f32 %v169_v18  ;;  %v179_v25 = vand.u32 2147483647, %v169_v18 }
  0xac   :  { %v182_v27 = vor.u32 1.1754944e-38, %v181_v24  ;;  %vm180_vm6 = vcmp.eq.f32.partialorder %v179_v25, 8.507059e+37 }
  0xb0   :  { %v1087_v19 = vpop.eup %1086 }
  0xb1   :  { %v171_v20 = vmul.f32 %v1087_v19, %v169_v18  ;;  %vm176_vm3 = vweird.f32 %v1087_v19 }
  0xb2   :  { %vm177_vm5 = vmor %vm175_vm4, %vm176_vm3 }
  0xb3   :  { %v172_v21 = vsub.f32 1.0, %v171_v20 }
  0xb5   :  { %v173_v22 = vmul.f32 %v1087_v19, %v172_v21  ;;  %v348_v21 = vld [vmem:[#allocation3 + $0x4] sm:$0x3] }
  0xb6   :  { %1045 = vmatmul.msk.f32.vlgmr.msrb.gmra.mxu1 %vm114_vm1, %v348_v21 }
  0xb7   :  { %v174_v23 = vadd.f32 %v1087_v19, %v173_v22  ;;  %670 = vmatpush.msrb.mxu1 %v1376_v34 }
  0xb9   :  { %v178_v26 = vsel %vm177_vm5, %v1087_v19, %v174_v23  ;;  %671 = vmatpush.msrb.mxu1 %v1378_v36 }
  0xba   :  { %v183_v29 = vsel %vm180_vm6, %v182_v27, %v178_v26 }
  0xbb   :  { %v196_v40 = vsub.f32 1.0, %v183_v29  ;;  %672 = vmatpush.msrb.mxu1 %v1382_v37 }
  0xbd   :  { %673 = vmatpush.msrb.mxu1 %v1387_v38 }
 0x10f   :  { %v187_v28 = vpop.permute.xlu0 %186 }
 0x110   :  { %v189_v30 = vmul.f32 %v187_v28, %v183_v29 }
 0x112   :  { %191 = vrot.lane.b32.xlu0 %v189_v30, %s1269_s23 }
 0x133   :  { %v369_v27 = vpop.f32.mrf.mxu1 }
 0x134   :  { %v370_v28 = vadd.f32 %v1370_v12, %v369_v27 }
 0x184   :  { %v192_v31 = vpop.permute.xlu0 %191 }
 0x185   :  { %v194_v32 = vadd.f32 %v192_v31, %v136_v14 }
 0x187   :  { %1088 = vtanh.f32 %v194_v32 }
 0x18d   :  { %v1089_v33 = vpop.eup %1088 }
 0x18e   :  { %198 = vrot.lane.b32.xlu1 %v1089_v33, %s1270_s2 }
 0x196   :  { %202 = vrot.lane.b32.xlu1 %v109_v8, %s1264_s13 }
 0x200   :  { %v199_v39 = vpop.permute.xlu1 %198 }
 0x201   :  { %v201_v42 = vmul.f32 %v199_v39, %v196_v40 }
 0x208   :  { %v203_v41 = vpop.permute.xlu1 %202 }
 0x209   :  { %v205_v43 = vmul.f32 %v203_v41, %v183_v29 }
 0x20b   :  { %v206_v44 = vadd.f32 %v205_v43, %v201_v42 }
 0x20d   :  { %211 = vrot.lane.b32.xlu2 %v206_v44, %s1270_s2 }
 0x267   :  { %v212_v45 = vpop.permute.xlu2 %211 }
 0x268   :  { %1040 = vmatmul.msk.f32.vlgmr.msra.gmra.mxu2 %vm141_vm2, %v212_v45  ;;  %1042 = vmatmul.msk.f32.vlgmr.msrb.gmra.mxu0 %vm141_vm2, %v212_v45 }
 0x269   :  { %559 = vmatpush.msra.mxu2 %v1376_v34  ;;  %588 = vmatpush.msrb.mxu0 %v1332_v3 }
 0x26b   :  { %560 = vmatpush.msra.mxu2 %v1378_v36  ;;  %589 = vmatpush.msrb.mxu0 %v1336_v4 }
 0x26d   :  { %561 = vmatpush.msra.mxu2 %v1382_v37 }
 0x26f   :  { %562 = vmatpush.msra.mxu2 %v1387_v38 }
 0x2e5   :  { %v278_v46 = vpop.f32.mrf.mxu0 }
 0x2e6   :  { %v279_v47 = vadd.f32 %v1363_v9, %v278_v46 }
 0x2e8   :  { %302 = vrot.lane.b32.xlu2 %v279_v47, %s1269_s23  ;;  %v281_v53 = vadd.f32 %v279_v47, %v259_v52 }
 0x2ea   :  { %v1043_v54 = vmul.f32 -1.442695, %v281_v53  ;;  %v459_v53 = vld [vmem:[#allocation3 + $0x6] sm:$0x3] }
 0x2eb   :  { %v232_v49 = vpop.f32.mrf.mxu2 }
 0x2ec   :  { %v233_v50 = vadd.f32 %v1417_v48, %v232_v49  ;;  %1090 = vpow2.f32 %v1043_v54 }
 0x2ee   :  { %235 = vst [vmem:[#allocation11] sm:$0x3] %v233_v50 }
 0x2f2   :  { %v1091_v55 = vpop.eup %1090 }
 0x2f3   :  { %v285_v56 = vadd.f32 1.0, %v1091_v55 }
 0x2f5   :  { %1092 = vrcp.f32 %v285_v56  ;;  %v297_v62 = vand.u32 2147483648, %v285_v56  ;;  %vm291_vm8 = vweird.f32 %v285_v56  ;;  %v295_v63 = vand.u32 2147483647, %v285_v56 }
 0x2f7   :  { %v298_v6 = vor.u32 1.1754944e-38, %v297_v62  ;;  %vm296_vm10 = vcmp.eq.f32.partialorder %v295_v63, 8.507059e+37 }
 0x2fb   :  { %v1093_v57 = vpop.eup %1092 }
 0x2fc   :  { %v287_v58 = vmul.f32 %v1093_v57, %v285_v56  ;;  %vm292_vm7 = vweird.f32 %v1093_v57 }
 0x2fd   :  { %vm293_vm9 = vmor %vm291_vm8, %vm292_vm7 }
 0x2fe   :  { %v288_v59 = vsub.f32 1.0, %v287_v58 }
 0x300   :  { %v289_v60 = vmul.f32 %v1093_v57, %v288_v59 }
 0x302   :  { %v290_v61 = vadd.f32 %v1093_v57, %v289_v60 }
 0x304   :  { %v294_v0 = vsel %vm293_vm9, %v1093_v57, %v290_v61 }
 0x305   :  { %v299_v10 = vsel %vm296_vm10, %v298_v6, %v294_v0 }
 0x306   :  { %v312_v16 = vsub.f32 1.0, %v299_v10  ;;  %v318_v18 = vmul.f32 %v299_v10, %v206_v44 }
 0x342   :  { %v303_v8 = vpop.permute.xlu2 %302 }
 0x343   :  { %v305_v11 = vmul.f32 %v303_v8, %v299_v10 }
 0x345   :  { %307 = vrot.lane.b32.xlu0 %v305_v11, %s1269_s23 }
 0x3b7   :  { %v308_v13 = vpop.permute.xlu0 %307 }
 0x3b8   :  { %v310_v14 = vadd.f32 %v308_v13, %v259_v52 }
 0x3ba   :  { %1094 = vtanh.f32 %v310_v14 }
 0x3c0   :  { %v1095_v15 = vpop.eup %1094 }
 0x3c1   :  { %314 = vrot.lane.b32.xlu1 %v1095_v15, %s1270_s2 }
 0x433   :  { %v315_v17 = vpop.permute.xlu1 %314 }
 0x434   :  { %v317_v19 = vmul.f32 %v315_v17, %v312_v16 }
 0x436   :  { %v319_v20 = vadd.f32 %v318_v18, %v317_v19 }
 0x438   :  { %321 = vrot.lane.b32.xlu2 %v319_v20, %s1270_s2 }
 0x492   :  { %v322_v22 = vpop.permute.xlu2 %321 }
 0x493   :  { %1044 = vmatmul.msk.f32.vlgmr.msrb.gmra.mxu3 %vm141_vm2, %v322_v22  ;;  %1046 = vmatmul.msk.f32.vlgmr.msrb.gmra.mxu2 %vm141_vm2, %v322_v22 }
 0x494   :  { %606 = vmatpush.msrb.mxu3 %v1328_v1  ;;  %699 = vmatpush.msrb.mxu2 %v1332_v3 }
 0x496   :  { %607 = vmatpush.msrb.mxu3 %v1330_v2  ;;  %700 = vmatpush.msrb.mxu2 %v1336_v4 }
 0x498   :  { %608 = vmatpush.msrb.mxu3 %v1338_v5 }
 0x49a   :  { %609 = vmatpush.msrb.mxu3 %v1343_v7 }
 0x49b   :  { %1049 = vmatmul.msk.f32.vlgmr.msra.gmra.mxu3 %vm114_vm1, %v459_v53 }
 0x49c   :  { %781 = vmatpush.msra.mxu3 %v1376_v34 }
 0x49e   :  { %782 = vmatpush.msra.mxu3 %v1378_v36 }
 0x4a0   :  { %783 = vmatpush.msra.mxu3 %v1382_v37 }
 0x4a2   :  { %784 = vmatpush.msra.mxu3 %v1387_v38 }
 0x516   :  { %v342_v23 = vpop.f32.mrf.mxu3  ;;  %v389_v24 = vpop.f32.mrf.mxu2 }
 0x517   :  { %v343_v25 = vadd.f32 %v1417_v48, %v342_v23  ;;  %v390_v26 = vadd.f32 %v1363_v9, %v389_v24 }
 0x519   :  { %346 = vst [vmem:[#allocation11 + $0x2] sm:$0x3] %v343_v25  ;;  %413 = vrot.lane.b32.xlu0 %v390_v26, %s1269_s23  ;;  %v392_v29 = vadd.f32 %v390_v26, %v370_v28 }
 0x51b   :  { %v1047_v30 = vmul.f32 -1.442695, %v392_v29 }
 0x51d   :  { %1096 = vpow2.f32 %v1047_v30 }
 0x51e   :  { %v480_v0 = vpop.f32.mrf.mxu3 }
 0x51f   :  { %v481_v6 = vadd.f32 %v1370_v12, %v480_v0  ;;  %v681_v0 = vld [vmem:[#allocation3 + $0xa] sm:$0x3] }
 0x523   :  { %v1097_v31 = vpop.eup %1096 }
 0x524   :  { %v396_v32 = vadd.f32 1.0, %v1097_v31 }
 0x526   :  { %1098 = vrcp.f32 %v396_v32  ;;  %v408_v42 = vand.u32 2147483648, %v396_v32  ;;  %vm402_vm12 = vweird.f32 %v396_v32  ;;  %v406_v43 = vand.u32 2147483647, %v396_v32 }
 0x528   :  { %v409_v45 = vor.u32 1.1754944e-38, %v408_v42  ;;  %vm407_vm14 = vcmp.eq.f32.partialorder %v406_v43, 8.507059e+37 }
 0x52c   :  { %v1099_v33 = vpop.eup %1098 }
 0x52d   :  { %v398_v35 = vmul.f32 %v1099_v33, %v396_v32  ;;  %vm403_vm11 = vweird.f32 %v1099_v33 }
 0x52e   :  { %vm404_vm13 = vmor %vm402_vm12, %vm403_vm11 }
 0x52f   :  { %v399_v39 = vsub.f32 1.0, %v398_v35  ;;  %v570_v35 = vld [vmem:[#allocation3 + $0x8] sm:$0x3] }
 0x531   :  { %v400_v40 = vmul.f32 %v1099_v33, %v399_v39 }
 0x533   :  { %v401_v41 = vadd.f32 %v1099_v33, %v400_v40 }
 0x535   :  { %v405_v44 = vsel %vm404_vm13, %v1099_v33, %v401_v41 }
 0x536   :  { %v410_v47 = vsel %vm407_vm14, %v409_v45, %v405_v44 }
 0x537   :  { %v423_v54 = vsub.f32 1.0, %v410_v47  ;;  %v429_v56 = vmul.f32 %v410_v47, %v319_v20 }
 0x58b   :  { %v414_v46 = vpop.permute.xlu0 %413 }
 0x58c   :  { %v416_v49 = vmul.f32 %v414_v46, %v410_v47 }
 0x58e   :  { %418 = vrot.lane.b32.xlu1 %v416_v49, %s1269_s23 }
 0x600   :  { %v419_v50 = vpop.permute.xlu1 %418 }
 0x601   :  { %v421_v51 = vadd.f32 %v419_v50, %v370_v28 }
 0x603   :  { %1100 = vtanh.f32 %v421_v51 }
 0x609   :  { %v1101_v52 = vpop.eup %1100 }
 0x60a   :  { %425 = vrot.lane.b32.xlu2 %v1101_v52, %s1270_s2 }
 0x664   :  { %v426_v55 = vpop.permute.xlu2 %425 }
 0x665   :  { %v428_v57 = vmul.f32 %v426_v55, %v423_v54 }
 0x667   :  { %v430_v58 = vadd.f32 %v429_v56, %v428_v57 }
 0x669   :  { %432 = vrot.lane.b32.xlu0 %v430_v58, %s1270_s2 }
 0x6db   :  { %v433_v59 = vpop.permute.xlu0 %432 }
 0x6dc   :  { %1048 = vmatmul.msk.f32.vlgmr.msra.gmra.mxu0 %vm141_vm2, %v433_v59  ;;  %1050 = vmatmul.msk.f32.vlgmr.msra.gmra.mxu1 %vm141_vm2, %v433_v59 }
 0x6dd   :  { %717 = vmatpush.msra.mxu0 %v1328_v1  ;;  %810 = vmatpush.msra.mxu1 %v1332_v3 }
 0x6df   :  { %718 = vmatpush.msra.mxu0 %v1330_v2  ;;  %811 = vmatpush.msra.mxu1 %v1336_v4 }
 0x6e1   :  { %719 = vmatpush.msra.mxu0 %v1338_v5 }
 0x6e3   :  { %720 = vmatpush.msra.mxu0 %v1343_v7 }
 0x6e4   :  { %1053 = vmatmul.msk.f32.vlgmr.msrb.gmra.mxu0 %vm114_vm1, %v570_v35 }
 0x6e5   :  { %892 = vmatpush.msrb.mxu0 %v1376_v34 }
 0x6e7   :  { %893 = vmatpush.msrb.mxu0 %v1378_v36 }
 0x6e9   :  { %894 = vmatpush.msrb.mxu0 %v1382_v37 }
 0x6eb   :  { %895 = vmatpush.msrb.mxu0 %v1387_v38 }
 0x759   :  { %v453_v60 = vpop.f32.mrf.mxu0  ;;  %v500_v61 = vpop.f32.mrf.mxu1 }
 0x75a   :  { %v454_v62 = vadd.f32 %v1417_v48, %v453_v60  ;;  %v501_v63 = vadd.f32 %v1363_v9, %v500_v61 }
 0x75c   :  { %457 = vst [vmem:[#allocation11 + $0x4] sm:$0x3] %v454_v62  ;;  %524 = vrot.lane.b32.xlu1 %v501_v63, %s1269_s23  ;;  %v503_v8 = vadd.f32 %v501_v63, %v481_v6 }
 0x75e   :  { %v1051_v10 = vmul.f32 -1.442695, %v503_v8 }
 0x760   :  { %1102 = vpow2.f32 %v1051_v10 }
 0x761   :  { %v591_v44 = vpop.f32.mrf.mxu0 }
 0x766   :  { %v1103_v11 = vpop.eup %1102 }
 0x767   :  { %v507_v13 = vadd.f32 1.0, %v1103_v11 }
 0x769   :  { %1104 = vrcp.f32 %v507_v13  ;;  %v519_v19 = vand.u32 2147483648, %v507_v13  ;;  %vm513_vm3 = vweird.f32 %v507_v13  ;;  %v517_v20 = vand.u32 2147483647, %v507_v13 }
 0x76b   :  { %v520_v22 = vor.u32 1.1754944e-38, %v519_v19  ;;  %vm518_vm5 = vcmp.eq.f32.partialorder %v517_v20, 8.507059e+37 }
 0x76f   :  { %v1105_v14 = vpop.eup %1104 }
 0x770   :  { %v509_v15 = vmul.f32 %v1105_v14, %v507_v13  ;;  %vm514_vm15 = vweird.f32 %v1105_v14 }
 0x771   :  { %vm515_vm4 = vmor %vm513_vm3, %vm514_vm15 }
 0x772   :  { %v510_v16 = vsub.f32 1.0, %v509_v15 }
 0x774   :  { %v511_v17 = vmul.f32 %v1105_v14, %v510_v16 }
 0x776   :  { %v512_v18 = vadd.f32 %v1105_v14, %v511_v17 }
 0x778   :  { %v516_v21 = vsel %vm515_vm4, %v1105_v14, %v512_v18 }
 0x779   :  { %v521_v24 = vsel %vm518_vm5, %v520_v22, %v516_v21 }
 0x77a   :  { %v534_v29 = vsub.f32 1.0, %v521_v24  ;;  %v540_v31 = vmul.f32 %v521_v24, %v430_v58 }
 0x7ce   :  { %v525_v23 = vpop.permute.xlu1 %524 }
 0x7cf   :  { %v527_v25 = vmul.f32 %v525_v23, %v521_v24 }
 0x7d1   :  { %529 = vrot.lane.b32.xlu2 %v527_v25, %s1269_s23 }
 0x82b   :  { %v530_v26 = vpop.permute.xlu2 %529 }
 0x82c   :  { %v532_v27 = vadd.f32 %v530_v26, %v481_v6 }
 0x82e   :  { %1106 = vtanh.f32 %v532_v27 }
 0x834   :  { %v1107_v28 = vpop.eup %1106 }
 0x835   :  { %536 = vrot.lane.b32.xlu0 %v1107_v28, %s1270_s2 }
 0x8a7   :  { %v537_v30 = vpop.permute.xlu0 %536 }
 0x8a8   :  { %v539_v32 = vmul.f32 %v537_v30, %v534_v29 }
 0x8aa   :  { %v541_v33 = vadd.f32 %v540_v31, %v539_v32 }
 0x8ac   :  { %543 = vrot.lane.b32.xlu1 %v541_v33, %s1270_s2 }
 0x91e   :  { %v544_v39 = vpop.permute.xlu1 %543 }
 0x91f   :  { %1052 = vmatmul.msk.f32.vlgmr.msra.gmra.mxu2 %vm141_vm2, %v544_v39  ;;  %1054 = vmatmul.msk.f32.vlgmr.msrb.gmra.mxu3 %vm141_vm2, %v544_v39 }
 0x920   :  { %828 = vmatpush.msra.mxu2 %v1328_v1  ;;  %921 = vmatpush.msrb.mxu3 %v1332_v3  ;;  %v592_v3 = vadd.f32 %v1370_v12, %v591_v44 }
 0x922   :  { %829 = vmatpush.msra.mxu2 %v1330_v2  ;;  %922 = vmatpush.msrb.mxu3 %v1336_v4 }
 0x924   :  { %830 = vmatpush.msra.mxu2 %v1338_v5 }
 0x926   :  { %831 = vmatpush.msra.mxu2 %v1343_v7 }
 0x927   :  { %1057 = vmatmul.msk.f32.vlgmr.msrb.gmra.mxu2 %vm114_vm1, %v681_v0 }
 0x928   :  { %1003 = vmatpush.msrb.mxu2 %v1376_v34 }
 0x92a   :  { %1004 = vmatpush.msrb.mxu2 %v1378_v36 }
 0x92c   :  { %1005 = vmatpush.msrb.mxu2 %v1382_v37 }
 0x92e   :  { %1006 = vmatpush.msrb.mxu2 %v1387_v38 }
 0x9a2   :  { %v564_v40 = vpop.f32.mrf.mxu2  ;;  %v611_v41 = vpop.f32.mrf.mxu3 }
 0x9a3   :  { %v565_v42 = vadd.f32 %v1417_v48, %v564_v40  ;;  %v612_v43 = vadd.f32 %v1363_v9, %v611_v41  ;;  %v792_v41 = vld [vmem:[#allocation3 + $0xc] sm:$0x3] }
 0x9a5   :  { %568 = vst [vmem:[#allocation11 + $0x6] sm:$0x3] %v565_v42  ;;  %635 = vrot.lane.b32.xlu2 %v612_v43, %s1269_s23  ;;  %v614_v45 = vadd.f32 %v612_v43, %v592_v3 }
 0x9a7   :  { %v1055_v46 = vmul.f32 -1.442695, %v614_v45 }
 0x9a9   :  { %1108 = vpow2.f32 %v1055_v46 }
 0x9aa   :  { %v702_v15 = vpop.f32.mrf.mxu2 }
 0x9ab   :  { %v703_v16 = vadd.f32 %v1370_v12, %v702_v15 }
 0x9af   :  { %v1109_v4 = vpop.eup %1108 }
 0x9b0   :  { %v618_v47 = vadd.f32 1.0, %v1109_v4 }
 0x9b2   :  { %1110 = vrcp.f32 %v618_v47  ;;  %v630_v54 = vand.u32 2147483648, %v618_v47  ;;  %vm624_vm7 = vweird.f32 %v618_v47  ;;  %v628_v55 = vand.u32 2147483647, %v618_v47 }
 0x9b4   :  { %v631_v57 = vor.u32 1.1754944e-38, %v630_v54  ;;  %vm629_vm9 = vcmp.eq.f32.partialorder %v628_v55, 8.507059e+37 }
 0x9b8   :  { %v1111_v49 = vpop.eup %1110 }
 0x9b9   :  { %v620_v50 = vmul.f32 %v1111_v49, %v618_v47  ;;  %vm625_vm6 = vweird.f32 %v1111_v49 }
 0x9ba   :  { %vm626_vm8 = vmor %vm624_vm7, %vm625_vm6 }
 0x9bb   :  { %v621_v51 = vsub.f32 1.0, %v620_v50 }
 0x9bd   :  { %v622_v52 = vmul.f32 %v1111_v49, %v621_v51 }
 0x9bf   :  { %v623_v53 = vadd.f32 %v1111_v49, %v622_v52 }
 0x9c1   :  { %v627_v56 = vsel %vm626_vm8, %v1111_v49, %v623_v53 }
 0x9c2   :  { %v632_v59 = vsel %vm629_vm9, %v631_v57, %v627_v56 }
 0x9c3   :  { %v645_v6 = vsub.f32 1.0, %v632_v59  ;;  %v651_v10 = vmul.f32 %v632_v59, %v541_v33 }
 0x9ff   :  { %v636_v58 = vpop.permute.xlu2 %635 }
 0xa00   :  { %v638_v60 = vmul.f32 %v636_v58, %v632_v59 }
 0xa02   :  { %640 = vrot.lane.b32.xlu0 %v638_v60, %s1269_s23 }
 0xa74   :  { %v641_v61 = vpop.permute.xlu0 %640 }
 0xa75   :  { %v643_v62 = vadd.f32 %v641_v61, %v592_v3 }
 0xa77   :  { %1112 = vtanh.f32 %v643_v62 }
 0xa7d   :  { %v1113_v63 = vpop.eup %1112 }
 0xa7e   :  { %647 = vrot.lane.b32.xlu1 %v1113_v63, %s1270_s2 }
 0xaf0   :  { %v648_v8 = vpop.permute.xlu1 %647 }
 0xaf1   :  { %v650_v11 = vmul.f32 %v648_v8, %v645_v6 }
 0xaf3   :  { %v652_v13 = vadd.f32 %v651_v10, %v650_v11  ;;  %v903_v10 = vld [vmem:[#allocation3 + $0xe] sm:$0x3] }
 0xaf5   :  { %654 = vrot.lane.b32.xlu2 %v652_v13, %s1270_s2 }
 0xb4f   :  { %v655_v14 = vpop.permute.xlu2 %654 }
 0xb50   :  { %1056 = vmatmul.msk.f32.vlgmr.msrb.gmra.mxu1 %vm141_vm2, %v655_v14  ;;  %1058 = vmatmul.msk.f32.vlgmr.msra.gmra.mxu0 %vm141_vm2, %v655_v14 }
 0xb51   :  { %939 = vmatpush.msrb.mxu1 %v1328_v1 }
 0xb53   :  { %940 = vmatpush.msrb.mxu1 %v1330_v2 }
 0xb55   :  { %941 = vmatpush.msrb.mxu1 %v1338_v5 }
 0xb57   :  { %942 = vmatpush.msrb.mxu1 %v1343_v7 }
 0xb58   :  { %1061 = vmatmul.msk.f32.vlgmr.msra.gmra.mxu1 %vm114_vm1, %v792_v41 }
 0xbcd   :  { %v675_v34 = vpop.f32.mrf.mxu1  ;;  %v722_v36 = vpop.f32.mrf.mxu0 }
 0xbce   :  { %v676_v37 = vadd.f32 %v1417_v48, %v675_v34  ;;  %v723_v38 = vadd.f32 %v1363_v9, %v722_v36 }
 0xbd0   :  { %679 = vst [vmem:[#allocation11 + $0x8] sm:$0x3] %v676_v37  ;;  %746 = vrot.lane.b32.xlu0 %v723_v38, %s1269_s23  ;;  %v725_v17 = vadd.f32 %v723_v38, %v703_v16 }
 0xbd2   :  { %v1059_v1 = vmul.f32 -1.442695, %v725_v17 }
 0xbd4   :  { %1114 = vpow2.f32 %v1059_v1 }
 0xbd5   :  { %v813_v46 = vpop.f32.mrf.mxu1 }
 0xbd6   :  { %v814_v4 = vadd.f32 %v1370_v12, %v813_v46 }
 0xbda   :  { %v1115_v2 = vpop.eup %1114 }
 0xbdb   :  { %v729_v18 = vadd.f32 1.0, %v1115_v2 }
 0xbdd   :  { %1116 = vrcp.f32 %v729_v18  ;;  %v741_v22 = vand.u32 2147483648, %v729_v18  ;;  %vm735_vm11 = vweird.f32 %v729_v18  ;;  %v739_v23 = vand.u32 2147483647, %v729_v18 }
 0xbdf   :  { %v742_v25 = vor.u32 1.1754944e-38, %v741_v22  ;;  %vm740_vm13 = vcmp.eq.f32.partialorder %v739_v23, 8.507059e+37 }
 0xbe3   :  { %v1117_v5 = vpop.eup %1116 }
 0xbe4   :  { %v731_v7 = vmul.f32 %v1117_v5, %v729_v18  ;;  %vm736_vm10 = vweird.f32 %v1117_v5 }
 0xbe5   :  { %vm737_vm12 = vmor %vm735_vm11, %vm736_vm10 }
 0xbe6   :  { %v732_v19 = vsub.f32 1.0, %v731_v7 }
 0xbe8   :  { %v733_v20 = vmul.f32 %v1117_v5, %v732_v19 }
 0xbea   :  { %v734_v21 = vadd.f32 %v1117_v5, %v733_v20 }
 0xbec   :  { %v738_v24 = vsel %vm737_vm12, %v1117_v5, %v734_v21 }
 0xbed   :  { %v743_v27 = vsel %vm740_vm13, %v742_v25, %v738_v24 }
 0xbee   :  { %v756_v32 = vsub.f32 1.0, %v743_v27  ;;  %v762_v35 = vmul.f32 %v743_v27, %v652_v13 }
 0xc42   :  { %v747_v26 = vpop.permute.xlu0 %746 }
 0xc43   :  { %v749_v28 = vmul.f32 %v747_v26, %v743_v27 }
 0xc45   :  { %751 = vrot.lane.b32.xlu1 %v749_v28, %s1269_s23 }
 0xcb7   :  { %v752_v29 = vpop.permute.xlu1 %751 }
 0xcb8   :  { %v754_v30 = vadd.f32 %v752_v29, %v703_v16 }
 0xcba   :  { %1118 = vtanh.f32 %v754_v30 }
 0xcc0   :  { %v1119_v31 = vpop.eup %1118 }
 0xcc1   :  { %758 = vrot.lane.b32.xlu2 %v1119_v31, %s1270_s2 }
 0xd1b   :  { %v759_v33 = vpop.permute.xlu2 %758 }
 0xd1c   :  { %v761_v39 = vmul.f32 %v759_v33, %v756_v32 }
 0xd1e   :  { %v763_v40 = vadd.f32 %v762_v35, %v761_v39 }
 0xd20   :  { %765 = vrot.lane.b32.xlu0 %v763_v40, %s1270_s2 }
 0xd92   :  { %v766_v42 = vpop.permute.xlu0 %765 }
 0xd93   :  { %1060 = vmatmul.msk.f32.vlgmr.msra.gmra.mxu3 %vm141_vm2, %v766_v42  ;;  %1062 = vmatmul.msk.f32.vlgmr.msra.gmra.mxu2 %vm141_vm2, %v766_v42 }
 0xd9b   :  { %1065 = vmatmul.msk.f32.vlgmr.msrb.gmra.mxu3 %vm114_vm1, %v903_v10 }
 0xe16   :  { %v786_v43 = vpop.f32.mrf.mxu3  ;;  %v833_v44 = vpop.f32.mrf.mxu2 }
 0xe17   :  { %v787_v3 = vadd.f32 %v1417_v48, %v786_v43  ;;  %v834_v45 = vadd.f32 %v1363_v9, %v833_v44 }
 0xe19   :  { %790 = vst [vmem:[#allocation11 + $0xa] sm:$0x3] %v787_v3  ;;  %857 = vrot.lane.b32.xlu1 %v834_v45, %s1269_s23  ;;  %v836_v47 = vadd.f32 %v834_v45, %v814_v4 }
 0xe1b   :  { %v1063_v49 = vmul.f32 -1.442695, %v836_v47 }
 0xe1d   :  { %1120 = vpow2.f32 %v1063_v49 }
 0xe1e   :  { %v924_v1 = vpop.f32.mrf.mxu3 }
 0xe1f   :  { %v925_v2 = vadd.f32 %v1370_v12, %v924_v1 }
 0xe23   :  { %v1121_v50 = vpop.eup %1120 }
 0xe24   :  { %v840_v51 = vadd.f32 1.0, %v1121_v50 }
 0xe26   :  { %1122 = vrcp.f32 %v840_v51  ;;  %v852_v57 = vand.u32 2147483648, %v840_v51  ;;  %vm846_vm15 = vweird.f32 %v840_v51  ;;  %v850_v58 = vand.u32 2147483647, %v840_v51 }
 0xe28   :  { %v853_v60 = vor.u32 1.1754944e-38, %v852_v57  ;;  %vm851_vm4 = vcmp.eq.f32.partialorder %v850_v58, 8.507059e+37 }
 0xe2c   :  { %v1123_v52 = vpop.eup %1122 }
 0xe2d   :  { %v842_v53 = vmul.f32 %v1123_v52, %v840_v51  ;;  %vm847_vm14 = vweird.f32 %v1123_v52 }
 0xe2e   :  { %vm848_vm3 = vmor %vm846_vm15, %vm847_vm14 }
 0xe2f   :  { %v843_v54 = vsub.f32 1.0, %v842_v53 }
 0xe31   :  { %v844_v55 = vmul.f32 %v1123_v52, %v843_v54 }
 0xe33   :  { %v845_v56 = vadd.f32 %v1123_v52, %v844_v55 }
 0xe35   :  { %v849_v59 = vsel %vm848_vm3, %v1123_v52, %v845_v56 }
 0xe36   :  { %v854_v62 = vsel %vm851_vm4, %v853_v60, %v849_v59 }
 0xe37   :  { %v867_v11 = vsub.f32 1.0, %v854_v62  ;;  %v873_v14 = vmul.f32 %v854_v62, %v763_v40 }
 0xe8b   :  { %v858_v61 = vpop.permute.xlu1 %857 }
 0xe8c   :  { %v860_v63 = vmul.f32 %v858_v61, %v854_v62 }
 0xe8e   :  { %862 = vrot.lane.b32.xlu2 %v860_v63, %s1269_s23 }
 0xee8   :  { %v863_v0 = vpop.permute.xlu2 %862 }
 0xee9   :  { %v865_v6 = vadd.f32 %v863_v0, %v814_v4 }
 0xeeb   :  { %1124 = vtanh.f32 %v865_v6 }
 0xef1   :  { %v1125_v8 = vpop.eup %1124 }
 0xef2   :  { %869 = vrot.lane.b32.xlu0 %v1125_v8, %s1270_s2 }
 0xf64   :  { %v870_v13 = vpop.permute.xlu0 %869 }
 0xf65   :  { %v872_v34 = vmul.f32 %v870_v13, %v867_v11 }
 0xf67   :  { %v874_v36 = vadd.f32 %v873_v14, %v872_v34 }
 0xf69   :  { %876 = vrot.lane.b32.xlu1 %v874_v36, %s1270_s2 }
 0xfdb   :  { %v877_v37 = vpop.permute.xlu1 %876 }
 0xfdc   :  { %1064 = vmatmul.msk.f32.vlgmr.msrb.gmra.mxu0 %vm141_vm2, %v877_v37  ;;  %1066 = vmatmul.msk.f32.vlgmr.msrb.gmra.mxu1 %vm141_vm2, %v877_v37 }
0x1059   :  { %v897_v38 = vpop.f32.mrf.mxu0  ;;  %v944_v15 = vpop.f32.mrf.mxu1 }
0x105a   :  { %v898_v16 = vadd.f32 %v1417_v48, %v897_v38  ;;  %v945_v17 = vadd.f32 %v1363_v9, %v944_v15 }
0x105c   :  { %901 = vst [vmem:[#allocation11 + $0xc] sm:$0x3] %v898_v16  ;;  %968 = vrot.lane.b32.xlu2 %v945_v17, %s1269_s23  ;;  %v947_v18 = vadd.f32 %v945_v17, %v925_v2 }
0x105e   :  { %v1067_v5 = vmul.f32 -1.442695, %v947_v18 }
0x1060   :  { %1126 = vpow2.f32 %v1067_v5 }
0x1066   :  { %v1127_v7 = vpop.eup %1126 }
0x1067   :  { %v951_v19 = vadd.f32 1.0, %v1127_v7 }
0x1069   :  { %1128 = vrcp.f32 %v951_v19  ;;  %v963_v25 = vand.u32 2147483648, %v951_v19  ;;  %vm957_vm5 = vweird.f32 %v951_v19  ;;  %v961_v9 = vand.u32 2147483647, %v951_v19 }
0x106b   :  { %v964_v27 = vor.u32 1.1754944e-38, %v963_v25  ;;  %vm962_vm7 = vcmp.eq.f32.partialorder %v961_v9, 8.507059e+37 }
0x106f   :  { %v1129_v20 = vpop.eup %1128 }
0x1070   :  { %v953_v21 = vmul.f32 %v1129_v20, %v951_v19  ;;  %vm958_vm1 = vweird.f32 %v1129_v20 }
0x1071   :  { %vm959_vm6 = vmor %vm957_vm5, %vm958_vm1 }
0x1072   :  { %v954_v22 = vsub.f32 1.0, %v953_v21 }
0x1074   :  { %v955_v23 = vmul.f32 %v1129_v20, %v954_v22 }
0x1076   :  { %v956_v24 = vadd.f32 %v1129_v20, %v955_v23 }
0x1078   :  { %v960_v26 = vsel %vm959_vm6, %v1129_v20, %v956_v24 }
0x1079   :  { %v965_v28 = vsel %vm962_vm7, %v964_v27, %v960_v26 }
0x107a   :  { %v978_v33 = vsub.f32 1.0, %v965_v28  ;;  %v984_v39 = vmul.f32 %v965_v28, %v874_v36 }
0x10b6   :  { %v969_v12 = vpop.permute.xlu2 %968 }
0x10b7   :  { %v971_v29 = vmul.f32 %v969_v12, %v965_v28 }
0x10b9   :  { %973 = vrot.lane.b32.xlu0 %v971_v29, %s1269_s23 }
0x112b   :  { %v974_v30 = vpop.permute.xlu0 %973 }
0x112c   :  { %v976_v31 = vadd.f32 %v974_v30, %v925_v2 }
0x112e   :  { %1130 = vtanh.f32 %v976_v31 }
0x1134   :  { %v1131_v32 = vpop.eup %1130 }
0x1135   :  { %980 = vrot.lane.b32.xlu1 %v1131_v32, %s1270_s2 }
0x11a7   :  { %v981_v35 = vpop.permute.xlu1 %980 }
0x11a8   :  { %v983_v40 = vmul.f32 %v981_v35, %v978_v33 }
0x11aa   :  { %v985_v41 = vadd.f32 %v984_v39, %v983_v40 }
0x11ac   :  { %987 = vrot.lane.b32.xlu2 %v985_v41, %s1270_s2 }
0x1206   :  { %v988_v42 = vpop.permute.xlu2 %987 }
0x1207   :  { %1015 = vst.msk [vmem:[#allocation2] sm:$0x3] %vm94_vm0, %v988_v42  ;;  %1068 = vmatmul.msk.f32.vlgmr.msrb.gmra.mxu2 %vm141_vm2, %v988_v42 }
0x128a   :  { %v1008_v43 = vpop.f32.mrf.mxu2 }
0x128b   :  { %v1009_v44 = vadd.f32 %v1417_v48, %v1008_v43 }
0x128d   :  { %1012 = vst [vmem:[#allocation11 + $0xe] sm:$0x3] %v1009_v44 }
0x128e   :  { %1028 = dma.vmem_to_hbm [thread:$0]  %s1021_s27, 256, %s1023_s30, [#allocation5], %s1264_s13, %s1264_s13, %s1265_s14  }
0x128f   :  { %1258 = dma.done.wait [#allocation5], 256  }
0x1290   :  { %1259 = vsyncadd [#allocation5], 4294967040 }
0x1291   :  { %1033 = vsyncpa [#allocation4], 1 }
0x1292   :  { %1034 = vsyncpa [#allocation7], 1 }
0x1293   :  { %1035 = vsyncpa [#allocation10], 1 }
0x1294   :  { %1036 = vsyncpa [#allocation5], 1 }

</bundles_post_ra>
